<compile_context>
chip_gen: v7x
topology: tpu7x:2x2x1
jax: 0.10.0
libtpu: 0.0.40
codegen_flags: <defaults>
</compile_context>

<pallas_src>
import functools

import jax
import jax.numpy as jnp
from jax.experimental import pallas as pl
from jax.experimental.pallas import tpu as pltpu


def _round_up(x, m):
    return ((x + m - 1) // m) * m


def _effective_weight(w_pos, w_neg):
    # posNet(w) = (w > 0).float()  ->  ternary effective weight in {-1, 0, +1}
    return (w_pos > 0).astype(jnp.float32) - (w_neg > 0).astype(jnp.float32)


def _conv_kernel(x_ref, w_ref, o_ref, *, KH, KW, TR, OW, S, Cin):
    """Implicit-GEMM conv for one (batch, row-band) x (Cout tile) block.

    x_ref: (1, BAND_H, Wp, Cin)  bf16 halo band of the spatially padded input
    w_ref: (KH*KW, Cin, TN)      bf16 ternary weights ({-1, 0, +1})
    o_ref: (1, TR*OW, TN)        f32 output tile
    """
    tn = o_ref.shape[-1]
    acc = jnp.zeros((TR * OW, tn), jnp.float32)
    if S > 1:
        # TODO(synk): stride > 1 takes strided value slices of the band;
        #             replace with a strided DMA gather if this path gets hot.
        band = x_ref[0]
    for kidx in range(KH * KW):           # static unroll over kernel positions
        kh, kw = divmod(kidx, KW)
        if S == 1:
            patch = x_ref[0, pl.ds(kh, TR), pl.ds(kw, OW), :]
        else:
            patch = band[kh:kh + (TR - 1) * S + 1:S,
                         kw:kw + (OW - 1) * S + 1:S, :]
        acc = acc + jnp.dot(patch.reshape(TR * OW, Cin), w_ref[kidx],
                            preferred_element_type=jnp.float32)
    o_ref[0] = acc


def _pick_row_tile(OH, OW, S, KH, Wp, Cin, tn, budget_bytes=6 << 20):
    """Largest output-row tile whose double-buffered band + f32 accumulator +
    double-buffered f32 output tile stay within ~6 MiB, leaving headroom under
    the scoped-VMEM defaults (16 MiB on v5e, 32 MiB on v6e/v7x; 64 MiB physical
    per TensorCore on v7x)."""
    best = 1
    for tr in range(1, OH + 1):
        band_h = (tr - 1) * S + KH
        band_bytes = 2 * band_h * Wp * Cin * 2        # bf16 input, 2 buffers
        acc_bytes = tr * OW * tn * 4                  # f32 accumulator value
        out_bytes = 2 * tr * OW * tn * 4              # f32 output, 2 buffers
        if band_bytes + acc_bytes + out_bytes <= budget_bytes:
            best = tr
        else:
            break
    return best


def ternary_conv2d(x_nchw, w_pos, w_neg, *, stride=1, padding=0):
    """Equivalent of Conv2d.forward for groups=1, dilation=1, bias=None."""
    N, Cin, H, W = x_nchw.shape
    Cout, Cin_w, KH, KW = w_pos.shape
    assert Cin == Cin_w, "groups != 1 not implemented"  # TODO(synk): groups>1
    S = stride
    OH = (H + 2 * padding - KH) // S + 1
    OW = (W + 2 * padding - KW) // S + 1
    Wp = W + 2 * padding

    # ---- Cout tiling: lane-dense (multiple of 128); collapse when <= 512 so
    #      the weight slab is fetched once and stays VMEM-resident. ----------
    Coutp = _round_up(Cout, 128)
    if Coutp <= 512:
        TN = Coutp
    else:
        TN = 512          # 2x the 256-wide v6e/v7x MXU; 4x128 on v5e
        Coutp = _round_up(Coutp, TN)
    J = Coutp // TN

    # ---- hoisted ternarization (once, outside the kernel); {-1,0,+1} exact
    #      in bf16.  Layout: (KH*KW, Cin, Coutp). --------------------------
    w_eff = _effective_weight(w_pos, w_neg)                 # (Cout,Cin,KH,KW)
    w_mat = jnp.transpose(w_eff, (2, 3, 1, 0)).reshape(KH * KW, Cin, Cout)
    if Coutp != Cout:
        w_mat = jnp.pad(w_mat, ((0, 0), (0, 0), (0, Coutp - Cout)))
    w_mat = w_mat.astype(jnp.bfloat16)

    # ---- row-band tiling (fused im2col via halo bands).  The matmul M dim is
    #      TR*OW; with typical OW >= 16 it stays 16-aligned for bf16 packing.
    TR = _pick_row_tile(OH, OW, S, KH, Wp, Cin, TN)
    RT = -(-OH // TR)
    TR = -(-OH // RT)                       # balance the last tile
    if N * RT * J == 1 and OH >= 2:
        RT, TR = 2, -(-OH // 2)             # keep both v7x TensorCores busy
    OHp = RT * TR
    BAND_H = (TR - 1) * S + KH
    G = N * RT

    # ---- cheap spatial pad (edges only — NOT a KH*KW-fold im2col) ----------
    x = jnp.transpose(x_nchw, (0, 2, 3, 1)).astype(jnp.bfloat16)        # NHWC
    rows_needed = (OHp - 1) * S + KH
    extra_h = max(0, rows_needed - (H + 2 * padding))
    xp = jnp.pad(x, ((0, 0), (padding, padding + extra_h),
                     (padding, padding), (0, 0)))
    if RT == 1:
        xb = xp[:, :BAND_H]                                 # (N, BAND_H, Wp, Cin)
    else:
        # Overlapping halo bands; redundancy is (KH-1)/(TR*S), not KH*KW.
        xb = jnp.stack([xp[:, r * TR * S:r * TR * S + BAND_H]
                        for r in range(RT)], axis=1)
        xb = xb.reshape(G, BAND_H, Wp, Cin)

    kernel = functools.partial(_conv_kernel, KH=KH, KW=KW, TR=TR, OW=OW,
                               S=S, Cin=Cin)

    cost = pl.CostEstimate(
        flops=2 * G * TR * OW * KH * KW * Cin * Coutp,
        transcendentals=0,
        bytes_accessed=int(xb.size) * 2 + int(w_mat.size) * 2
                       + G * TR * OW * Coutp * 4,
    )

    out = pl.pallas_call(
        kernel,
        out_shape=jax.ShapeDtypeStruct((G, TR * OW, Coutp), jnp.float32),
        grid_spec=pltpu.PrefetchScalarGridSpec(
            num_scalar_prefetch=0,
            grid=(G, J),                 # Cout innermost: band never re-fetched
            in_specs=[
                pl.BlockSpec((1, BAND_H, Wp, Cin), lambda g, j: (g, 0, 0, 0)),
                pl.BlockSpec((KH * KW, Cin, TN), lambda g, j: (0, 0, j)),
            ],
            out_specs=pl.BlockSpec((1, TR * OW, TN), lambda g, j: (g, 0, j)),
        ),
        compiler_params=pltpu.CompilerParams(
            dimension_semantics=("parallel", "parallel")),
        cost_estimate=cost,
    )(xb, w_mat)

    out = out.reshape(N, OHp, OW, Coutp)[:, :OH, :, :Cout]
    # TODO(synk): skip this NHWC->NCHW transpose if the consumer takes NHWC.
    return jnp.transpose(out, (0, 3, 1, 2))                             # NCHW


def _reference(x_nchw_f32, w_pos, w_neg, *, stride, padding):
    w_eff = _effective_weight(w_pos, w_neg)
    return jax.lax.conv_general_dilated(
        x_nchw_f32, w_eff,
        window_strides=(stride, stride),
        padding=((padding, padding), (padding, padding)),
        dimension_numbers=("NCHW", "OIHW", "NCHW"),
    )


if __name__ == "__main__":
    # Module config: Conv2d(x=4, y=8, kernel_size=3, stride=1, padding=1)
    N, Cin, H, W = 2, 4, 16, 16
    Cout, KH, KW = 8, 3, 3
    stride, padding = 1, 1

    key = jax.random.PRNGKey(0)
    kx, kp, kn = jax.random.split(key, 3)
    x = jax.random.normal(kx, (N, Cin, H, W), dtype=jnp.float32)
    # torch.nn.init.uniform_(weight, -1, 1)
    w_pos = jax.random.uniform(kp, (Cout, Cin, KH, KW), jnp.float32, -1.0, 1.0)
    w_neg = jax.random.uniform(kn, (Cout, Cin, KH, KW), jnp.float32, -1.0, 1.0)

    y = ternary_conv2d(x, w_pos, w_neg, stride=stride, padding=padding)
    y = jax.block_until_ready(y)
    assert y.shape == (N, Cout, H, W), y.shape

    # Tight check: reference with the same bf16 activation quantization.
    y_q = _reference(x.astype(jnp.bfloat16).astype(jnp.float32), w_pos, w_neg,
                     stride=stride, padding=padding)
    assert jnp.allclose(y, y_q, atol=1e-3, rtol=1e-3), "mismatch (quantized ref)"

    # Honest check vs the true fp32 forward (bf16-activation error budget).
    y_f = _reference(x, w_pos, w_neg, stride=stride, padding=padding)
    assert jnp.allclose(y, y_f, atol=5e-2, rtol=1e-2), "mismatch (fp32 ref)"

    print("KERNEL_OK")
</pallas_src>

<mosaic_0001>
module attributes {stable_mosaic.version = 11 : i64} {
  func.func @_conv_kernel(%arg0: i32, %arg1: i32, %arg2: memref<1x18x18x4xbf16, #tpu.memory_space<vmem>>, %arg3: memref<9x4x128xbf16, #tpu.memory_space<vmem>>, %arg4: memref<1x256x128xf32, #tpu.memory_space<vmem>>) attributes {dimension_semantics = [#tpu.dimension_semantics<parallel>, #tpu.dimension_semantics<parallel>], iteration_bounds = array<i64: 2, 1>, scalar_prefetch = 0 : i64, scratch_operands = 0 : i64, tpu.core_type = #tpu.core_type<tc>, window_params = [{transform_indices = @transform_0, window_bounds = array<i64: 1, 18, 18, 4>}, {transform_indices = @transform_1, window_bounds = array<i64: 9, 4, 128>}, {transform_indices = @transform_2, window_bounds = array<i64: 1, 256, 128>}]} {
    %cst = arith.constant 0.000000e+00 : f32
    %0 = vector.broadcast %cst : f32 to vector<256x128xf32>
    %c0 = arith.constant 0 : index
    %c0_0 = arith.constant 0 : index
    %c0_1 = arith.constant 0 : index
    %c0_2 = arith.constant 0 : index
    %1 = vector.load %arg2[%c0, %c0_0, %c0_1, %c0_2] : memref<1x18x18x4xbf16, #tpu.memory_space<vmem>>, vector<1x16x16x4xbf16>
    %2 = vector.shape_cast %1 : vector<1x16x16x4xbf16> to vector<16x16x4xbf16>
    %3 = vector.shape_cast %2 : vector<16x16x4xbf16> to vector<256x4xbf16>
    %c0_3 = arith.constant 0 : index
    %c0_4 = arith.constant 0 : index
    %c0_5 = arith.constant 0 : index
    %4 = vector.load %arg3[%c0_3, %c0_4, %c0_5] : memref<9x4x128xbf16, #tpu.memory_space<vmem>>, vector<1x4x128xbf16>
    %5 = vector.shape_cast %4 : vector<1x4x128xbf16> to vector<4x128xbf16>
    %cst_6 = arith.constant dense<0.000000e+00> : vector<256x128xf32>
    %6 = tpu.matmul %3, %5, %cst_6 {dimension_numbers = #tpu.dot_dimension_numbers<[1], [0], [0], [1], [0, 0, 1, 1], [], []>} : vector<256x4xbf16>, vector<4x128xbf16>, vector<256x128xf32> -> vector<256x128xf32>
    %7 = arith.addf %0, %6 : vector<256x128xf32>
    %c0_7 = arith.constant 0 : index
    %c0_8 = arith.constant 0 : index
    %c1 = arith.constant 1 : index
    %c0_9 = arith.constant 0 : index
    %8 = vector.load %arg2[%c0_7, %c0_8, %c1, %c0_9] : memref<1x18x18x4xbf16, #tpu.memory_space<vmem>>, vector<1x16x16x4xbf16>
    %9 = vector.shape_cast %8 : vector<1x16x16x4xbf16> to vector<16x16x4xbf16>
    %10 = vector.shape_cast %9 : vector<16x16x4xbf16> to vector<256x4xbf16>
    %c1_10 = arith.constant 1 : index
    %c0_11 = arith.constant 0 : index
    %c0_12 = arith.constant 0 : index
    %11 = vector.load %arg3[%c1_10, %c0_11, %c0_12] : memref<9x4x128xbf16, #tpu.memory_space<vmem>>, vector<1x4x128xbf16>
    %12 = vector.shape_cast %11 : vector<1x4x128xbf16> to vector<4x128xbf16>
    %cst_13 = arith.constant dense<0.000000e+00> : vector<256x128xf32>
    %13 = tpu.matmul %10, %12, %cst_13 {dimension_numbers = #tpu.dot_dimension_numbers<[1], [0], [0], [1], [0, 0, 1, 1], [], []>} : vector<256x4xbf16>, vector<4x128xbf16>, vector<256x128xf32> -> vector<256x128xf32>
    %14 = arith.addf %7, %13 : vector<256x128xf32>
    %c0_14 = arith.constant 0 : index
    %c0_15 = arith.constant 0 : index
    %c2 = arith.constant 2 : index
    %c0_16 = arith.constant 0 : index
    %15 = vector.load %arg2[%c0_14, %c0_15, %c2, %c0_16] : memref<1x18x18x4xbf16, #tpu.memory_space<vmem>>, vector<1x16x16x4xbf16>
    %16 = vector.shape_cast %15 : vector<1x16x16x4xbf16> to vector<16x16x4xbf16>
    %17 = vector.shape_cast %16 : vector<16x16x4xbf16> to vector<256x4xbf16>
    %c2_17 = arith.constant 2 : index
    %c0_18 = arith.constant 0 : index
    %c0_19 = arith.constant 0 : index
    %18 = vector.load %arg3[%c2_17, %c0_18, %c0_19] : memref<9x4x128xbf16, #tpu.memory_space<vmem>>, vector<1x4x128xbf16>
    %19 = vector.shape_cast %18 : vector<1x4x128xbf16> to vector<4x128xbf16>
    %cst_20 = arith.constant dense<0.000000e+00> : vector<256x128xf32>
    %20 = tpu.matmul %17, %19, %cst_20 {dimension_numbers = #tpu.dot_dimension_numbers<[1], [0], [0], [1], [0, 0, 1, 1], [], []>} : vector<256x4xbf16>, vector<4x128xbf16>, vector<256x128xf32> -> vector<256x128xf32>
    %21 = arith.addf %14, %20 : vector<256x128xf32>
    %c0_21 = arith.constant 0 : index
    %c1_22 = arith.constant 1 : index
    %c0_23 = arith.constant 0 : index
    %c0_24 = arith.constant 0 : index
    %22 = vector.load %arg2[%c0_21, %c1_22, %c0_23, %c0_24] : memref<1x18x18x4xbf16, #tpu.memory_space<vmem>>, vector<1x16x16x4xbf16>
    %23 = vector.shape_cast %22 : vector<1x16x16x4xbf16> to vector<16x16x4xbf16>
    %24 = vector.shape_cast %23 : vector<16x16x4xbf16> to vector<256x4xbf16>
    %c3 = arith.constant 3 : index
    %c0_25 = arith.constant 0 : index
    %c0_26 = arith.constant 0 : index
    %25 = vector.load %arg3[%c3, %c0_25, %c0_26] : memref<9x4x128xbf16, #tpu.memory_space<vmem>>, vector<1x4x128xbf16>
    %26 = vector.shape_cast %25 : vector<1x4x128xbf16> to vector<4x128xbf16>
    %cst_27 = arith.constant dense<0.000000e+00> : vector<256x128xf32>
    %27 = tpu.matmul %24, %26, %cst_27 {dimension_numbers = #tpu.dot_dimension_numbers<[1], [0], [0], [1], [0, 0, 1, 1], [], []>} : vector<256x4xbf16>, vector<4x128xbf16>, vector<256x128xf32> -> vector<256x128xf32>
    %28 = arith.addf %21, %27 : vector<256x128xf32>
    %c0_28 = arith.constant 0 : index
    %c1_29 = arith.constant 1 : index
    %c1_30 = arith.constant 1 : index
    %c0_31 = arith.constant 0 : index
    %29 = vector.load %arg2[%c0_28, %c1_29, %c1_30, %c0_31] : memref<1x18x18x4xbf16, #tpu.memory_space<vmem>>, vector<1x16x16x4xbf16>
    %30 = vector.shape_cast %29 : vector<1x16x16x4xbf16> to vector<16x16x4xbf16>
    %31 = vector.shape_cast %30 : vector<16x16x4xbf16> to vector<256x4xbf16>
    %c4 = arith.constant 4 : index
    %c0_32 = arith.constant 0 : index
    %c0_33 = arith.constant 0 : index
    %32 = vector.load %arg3[%c4, %c0_32, %c0_33] : memref<9x4x128xbf16, #tpu.memory_space<vmem>>, vector<1x4x128xbf16>
    %33 = vector.shape_cast %32 : vector<1x4x128xbf16> to vector<4x128xbf16>
    %cst_34 = arith.constant dense<0.000000e+00> : vector<256x128xf32>
    %34 = tpu.matmul %31, %33, %cst_34 {dimension_numbers = #tpu.dot_dimension_numbers<[1], [0], [0], [1], [0, 0, 1, 1], [], []>} : vector<256x4xbf16>, vector<4x128xbf16>, vector<256x128xf32> -> vector<256x128xf32>
    %35 = arith.addf %28, %34 : vector<256x128xf32>
    %c0_35 = arith.constant 0 : index
    %c1_36 = arith.constant 1 : index
    %c2_37 = arith.constant 2 : index
    %c0_38 = arith.constant 0 : index
    %36 = vector.load %arg2[%c0_35, %c1_36, %c2_37, %c0_38] : memref<1x18x18x4xbf16, #tpu.memory_space<vmem>>, vector<1x16x16x4xbf16>
    %37 = vector.shape_cast %36 : vector<1x16x16x4xbf16> to vector<16x16x4xbf16>
    %38 = vector.shape_cast %37 : vector<16x16x4xbf16> to vector<256x4xbf16>
    %c5 = arith.constant 5 : index
    %c0_39 = arith.constant 0 : index
    %c0_40 = arith.constant 0 : index
    %39 = vector.load %arg3[%c5, %c0_39, %c0_40] : memref<9x4x128xbf16, #tpu.memory_space<vmem>>, vector<1x4x128xbf16>
    %40 = vector.shape_cast %39 : vector<1x4x128xbf16> to vector<4x128xbf16>
    %cst_41 = arith.constant dense<0.000000e+00> : vector<256x128xf32>
    %41 = tpu.matmul %38, %40, %cst_41 {dimension_numbers = #tpu.dot_dimension_numbers<[1], [0], [0], [1], [0, 0, 1, 1], [], []>} : vector<256x4xbf16>, vector<4x128xbf16>, vector<256x128xf32> -> vector<256x128xf32>
    %42 = arith.addf %35, %41 : vector<256x128xf32>
    %c0_42 = arith.constant 0 : index
    %c2_43 = arith.constant 2 : index
    %c0_44 = arith.constant 0 : index
    %c0_45 = arith.constant 0 : index
    %43 = vector.load %arg2[%c0_42, %c2_43, %c0_44, %c0_45] : memref<1x18x18x4xbf16, #tpu.memory_space<vmem>>, vector<1x16x16x4xbf16>
    %44 = vector.shape_cast %43 : vector<1x16x16x4xbf16> to vector<16x16x4xbf16>
    %45 = vector.shape_cast %44 : vector<16x16x4xbf16> to vector<256x4xbf16>
    %c6 = arith.constant 6 : index
    %c0_46 = arith.constant 0 : index
    %c0_47 = arith.constant 0 : index
    %46 = vector.load %arg3[%c6, %c0_46, %c0_47] : memref<9x4x128xbf16, #tpu.memory_space<vmem>>, vector<1x4x128xbf16>
    %47 = vector.shape_cast %46 : vector<1x4x128xbf16> to vector<4x128xbf16>
    %cst_48 = arith.constant dense<0.000000e+00> : vector<256x128xf32>
    %48 = tpu.matmul %45, %47, %cst_48 {dimension_numbers = #tpu.dot_dimension_numbers<[1], [0], [0], [1], [0, 0, 1, 1], [], []>} : vector<256x4xbf16>, vector<4x128xbf16>, vector<256x128xf32> -> vector<256x128xf32>
    %49 = arith.addf %42, %48 : vector<256x128xf32>
    %c0_49 = arith.constant 0 : index
    %c2_50 = arith.constant 2 : index
    %c1_51 = arith.constant 1 : index
    %c0_52 = arith.constant 0 : index
    %50 = vector.load %arg2[%c0_49, %c2_50, %c1_51, %c0_52] : memref<1x18x18x4xbf16, #tpu.memory_space<vmem>>, vector<1x16x16x4xbf16>
    %51 = vector.shape_cast %50 : vector<1x16x16x4xbf16> to vector<16x16x4xbf16>
    %52 = vector.shape_cast %51 : vector<16x16x4xbf16> to vector<256x4xbf16>
    %c7 = arith.constant 7 : index
    %c0_53 = arith.constant 0 : index
    %c0_54 = arith.constant 0 : index
    %53 = vector.load %arg3[%c7, %c0_53, %c0_54] : memref<9x4x128xbf16, #tpu.memory_space<vmem>>, vector<1x4x128xbf16>
    %54 = vector.shape_cast %53 : vector<1x4x128xbf16> to vector<4x128xbf16>
    %cst_55 = arith.constant dense<0.000000e+00> : vector<256x128xf32>
    %55 = tpu.matmul %52, %54, %cst_55 {dimension_numbers = #tpu.dot_dimension_numbers<[1], [0], [0], [1], [0, 0, 1, 1], [], []>} : vector<256x4xbf16>, vector<4x128xbf16>, vector<256x128xf32> -> vector<256x128xf32>
    %56 = arith.addf %49, %55 : vector<256x128xf32>
    %c0_56 = arith.constant 0 : index
    %c2_57 = arith.constant 2 : index
    %c2_58 = arith.constant 2 : index
    %c0_59 = arith.constant 0 : index
    %57 = vector.load %arg2[%c0_56, %c2_57, %c2_58, %c0_59] : memref<1x18x18x4xbf16, #tpu.memory_space<vmem>>, vector<1x16x16x4xbf16>
    %58 = vector.shape_cast %57 : vector<1x16x16x4xbf16> to vector<16x16x4xbf16>
    %59 = vector.shape_cast %58 : vector<16x16x4xbf16> to vector<256x4xbf16>
    %c8 = arith.constant 8 : index
    %c0_60 = arith.constant 0 : index
    %c0_61 = arith.constant 0 : index
    %60 = vector.load %arg3[%c8, %c0_60, %c0_61] : memref<9x4x128xbf16, #tpu.memory_space<vmem>>, vector<1x4x128xbf16>
    %61 = vector.shape_cast %60 : vector<1x4x128xbf16> to vector<4x128xbf16>
    %cst_62 = arith.constant dense<0.000000e+00> : vector<256x128xf32>
    %62 = tpu.matmul %59, %61, %cst_62 {dimension_numbers = #tpu.dot_dimension_numbers<[1], [0], [0], [1], [0, 0, 1, 1], [], []>} : vector<256x4xbf16>, vector<4x128xbf16>, vector<256x128xf32> -> vector<256x128xf32>
    %63 = arith.addf %56, %62 : vector<256x128xf32>
    %c0_63 = arith.constant 0 : index
    %c0_64 = arith.constant 0 : index
    %c0_65 = arith.constant 0 : index
    %64 = vector.load %arg4[%c0_63, %c0_64, %c0_65] : memref<1x256x128xf32, #tpu.memory_space<vmem>>, vector<1x256x128xf32>
    %65 = vector.shape_cast %64 : vector<1x256x128xf32> to vector<256x128xf32>
    %66 = vector.shape_cast %63 : vector<256x128xf32> to vector<1x256x128xf32>
    tpu.vector_store %arg4[%c0_63, %c0_64, %c0_65], %66 {strides = array<i32>} : memref<1x256x128xf32, #tpu.memory_space<vmem>>, vector<1x256x128xf32>,
    return
  }
  func.func @transform_0(%arg0: i32, %arg1: i32) -> (i32, i32, i32, i32) {
    %c0_i32 = arith.constant 0 : i32
    %c0_i32_0 = arith.constant 0 : i32
    %c0_i32_1 = arith.constant 0 : i32
    %c0_i32_2 = arith.constant 0 : i32
    return %arg0, %c0_i32, %c0_i32_0, %c0_i32_1 : i32, i32, i32, i32
  }
  func.func @transform_1(%arg0: i32, %arg1: i32) -> (i32, i32, i32) {
    %c0_i32 = arith.constant 0 : i32
    %c0_i32_0 = arith.constant 0 : i32
    %c0_i32_1 = arith.constant 0 : i32
    return %c0_i32, %c0_i32_0, %arg1 : i32, i32, i32
  }
  func.func @transform_2(%arg0: i32, %arg1: i32) -> (i32, i32, i32) {
    %c0_i32 = arith.constant 0 : i32
    %c0_i32_0 = arith.constant 0 : i32
    return %arg0, %c0_i32, %arg1 : i32, i32, i32
  }
}

</mosaic_0001>

<bundles_post_ra>
// kernel: tpu_custom_call.1
= control target key start
LH: loop header
LB: loop body
LE: loop exit
PB: predicated region body
PF: predicated region fallthrough
CT: control target
= control target key end

     0   :  { %7 = vsyncpa [#allocation3], 0  ;;  %s8256_s0 = inlined_call_operand.vmem [shape: bf16[2,18,18,4], index: 0, kind: input, shape index: {}]   ;;  %s8257_s1 = inlined_call_operand.vmem [shape: bf16[9,4,128], index: 1, kind: input, shape index: {}]   ;;  %s8258_s2 = inlined_call_operand.hbm [shape: f32[2,256,128], index: 2, kind: output, shape index: {}]  }
   0x1   :  { %9 = vsyncpa [#allocation3 + $0x1], 0  ;;  %s6405_s9 = smov 0   ;;  %s6407_s10 = smov 0  }
   0x2   :  { %s6409_s11 = smov 0   ;;  %s6411_s12 = smov 0  }
   0x3   :  { %s6413_s13 = smov 0   ;;  %s6415_s14 = smov 0  }
   0x4 LB: > { %s4867_s15 = sadd.s32 4294967295, %s6385_s14   ;;  %s4868_s16 = sadd.s32 4294967294, %s6385_s14   ;;  %s6385_s14 = sphi %s6415_s14, %s15_s14   ;;  %s6381_s13 = sphi %s6413_s13, %s8332_s13   ;;  %s6377_s12 = sphi %s6411_s12, %s8331_s12   ;;  %s6373_s11 = sphi %s6409_s11, %s8330_s11   ;;  %s6369_s10 = sphi %s6407_s10, %s8329_s10   ;;  %s6365_s9 = sphi %s6405_s9, %s8328_s9  }
   0x5   : > { %s27_s17 = sadd.s32 1, %s6381_s13  ;;  %s88_s18 = sadd.s32 1, %s6373_s11 }
   0x6   : > { %p29_p0 = scmp.ge.s32.totalorder %s27_s17, 2  ;;  %p98_p1 = scmp.ne.s32.totalorder %s6373_s11, %s6369_s10 }
   0x7   : > { %p99_p2 = scmp.eq.s32.totalorder %s4867_s15, 1  ;;  %p104_p3 = scmp.ne.s32.totalorder %s6369_s10, %s6365_s9 }
   0x8   : > { %s8334_s17 = smov (%p29_p0, %s27_s17), 0  ;;  %p105_p5 = scmp.eq.s32.totalorder %s4868_s16, 1 }
   0x9   : > { %p6445_p4 = por %p99_p2, %p98_p1  ;;  %s83_s20 = ssub.s32 %s6381_s13, %s8334_s17 }
   0xa   : > { %p4872_p6 = scmp.ge.s32.totalorder %s6385_s14, 1  ;;  %p86_p7 = scmp.eq.s32.totalorder %s83_s20, 0 }
   0xb   : > { %p6452_p8 = por %p105_p5, %p104_p3  ;;  %p138_p9 = scmp.lt.s32.totalorder %s6385_s14, 3 }
   0xc   : > { %s6458_s22 = scalar_select %p86_p7, %s6373_s11, %s88_s18  }
   0xd   : > { %p139_p10 = pnand %p4872_p6, %p138_p9 }
   0xf   : > { %142 = sbr.rel (%p139_p10) target bundleno = 607 (0x25f), region = 28 }
  0x16   : > { %v4875_v0 = vld [vmem:[%s8257_s1 + $0x2] sm:$0x3]  ;;  %vm709_vm0 = vcmask 1041408   ;;  %v5102_v1 = vld [vmem:[%s8257_s1 + $0x8] sm:$0x3]  ;;  %p164_p11 = scmp.lt.s32.totalorder %s6377_s12, 1 }
  0x17   : > { %6134 = vmatprep.subr.msk.bf16.mxu1 %vm709_vm0, %v4875_v0  ;;  %6138 = vmatprep.subr.msk.bf16.mxu0 %vm709_vm0, %v5102_v1  ;;  %v711_v2 = vsel %vm709_vm0, %v4875_v0, 0  ;;  %v6471_v3 = vsel %vm709_vm0, %v5102_v1, 0  ;;  %v206_v4 = vld [vmem:[%s8257_s1] sm:$0x3]  ;;  %v5167_v5 = vld [vmem:[%s8257_s1 + $0xa] sm:$0x3] }
  0x18   : > { %8274 = vst [vmem:[#allocation5_spill] sm:$0xff] %v6471_v3  ;;  %5571 = vmatpush3.bf16.msra.mxu1 %v711_v2  ;;  %5707 = vmatpush3.bf16.msra.mxu0 %v6471_v3  ;;  %s165_s27 = scalar_select %p164_p11, %s6377_s12, 1  ;;  %vm223_vm1 = vsmask.f32 3328  ;;  %vm224_vm2 = vsmask.f32 7440 }
  0x19   : > { %6135 = vmatprep.subr.msk.bf16.mxu1 %vm709_vm0, %v206_v4  ;;  %6140 = vmatprep.subr.msk.bf16.mxu0 %vm709_vm0, %v5167_v5  ;;  %vm660_vm3 = vcmask 31744   ;;  %v6499_v17 = vsel %vm709_vm0, %v206_v4, 0  ;;  %v6505_v26 = vld [vmem:[%s8257_s1 + $0xc] sm:$0x3]  ;;  %vm6512_vm4 = vmor %vm223_vm1, %vm224_vm2  ;;  %v6518_v37 = vsel %vm709_vm0, %v5167_v5, 0  ;;  %vm1214_vm5 = vcmask 1042432  }
  0x1a   : > { %s6144_s4 = smul.u32 216, %s165_s27  ;;  %v6522_v41 = vsel %vm709_vm0, %v6505_v26, 0  ;;  %vm1215_vm6 = vcmask 1046532   ;;  %s6387_s23 = smov [#allocation2]  }
  0x1b   : > { %vm6738_vm7 = vmor %vm1214_vm5, %vm1215_vm6  ;;  %s6311_s24 = sshll.u32 %s6387_s23, 4  ;;  %s6312_s24 = int_to_ptr.vmem [resolvable:$false] %s6311_s24 }
  0x1c   : > { %s6486_s7 = scalar_lea.vmem %s8256_s0, %s6144_s4  ;;  %s161_s4 = sand.u32 1, %s6369_s10  }
  0x1d   : > { %v174_v6 = vld [vmem:[%s6486_s7] sm:$0xf]  ;;  %v175_v7 = vld [vmem:[%s6486_s7 + $0x4] sm:$0xf]  ;;  %v207_v8 = vld [vmem:[%s6486_s7 + $0x8] sm:$0x1] }
  0x1e   : > { %v227_v9 = vshrl.u32 %v174_v6, 16  ;;  %v230_v10 = vshll.u32 %v174_v6, 16  ;;  %v236_v11 = vshll.u32 %v175_v7, 16  ;;  %v240_v12 = vshrl.u32 %v175_v7, 16  ;;  %v5054_v13 = vld [vmem:[%s6486_s7 + $0xc] sm:$0xf] }
  0x1f   : > { %v246_v14 = vshll.u32 %v207_v8, 16  ;;  %v6493_v15 = vld [vmem:[%s6486_s7 + $0x10] sm:$0xf]  ;;  %v6496_v16 = vld [vmem:[%s6486_s7 + $0x14] sm:$0x1]  ;;  %v2031_v23 = vshrl.u32 %v5054_v13, 16 }
  0x20   : > { %v229_v18 = vrot.slane %v227_v9, 4  ;;  %v232_v19 = vrot.slane %v230_v10, 5  ;;  %v238_v20 = vrot.slane %v236_v11, 5  ;;  %v242_v21 = vrot.slane %v240_v12, 4  ;;  %v176_v31 = vld [vmem:[%s6486_s7 + $0xc] sm:$0xf] }
  0x21   : > { %v248_v22 = vrot.slane %v246_v14, 5  ;;  %v2034_v24 = vshll.u32 %v5054_v13, 16  ;;  %v2040_v25 = vshll.u32 %v6493_v15, 16  ;;  %v2044_v29 = vshrl.u32 %v6493_v15, 16  ;;  %v177_v36 = vld [vmem:[%s6486_s7 + $0x10] sm:$0xf] }
  0x22   : > { %v233_v27 = vor.u32 %v232_v19, %v229_v18  ;;  %v243_v28 = vor.u32 %v242_v21, %v238_v20  ;;  %v2050_v30 = vshll.u32 %v6496_v16, 16  ;;  %v2033_v33 = vrot.slane %v2031_v23, 4  ;;  %v208_v44 = vld [vmem:[%s6486_s7 + $0x14] sm:$0x1]  ;;  %v5057_v55 = vld [vmem:[%s6486_s7 + $0x18] sm:$0xf] }
  0x23   : > { %v2036_v34 = vrot.slane %v2034_v24, 5  ;;  %v2042_v35 = vrot.slane %v2040_v25, 5  ;;  %v2046_v40 = vrot.slane %v2044_v29, 4  ;;  %v251_v45 = vshrl.u32 %v176_v31, 16  ;;  %v6531_v60 = vld [vmem:[%s6486_s7 + $0x1c] sm:$0xf] }
  0x24   : > { %v234_v38 = vrot.slane %v233_v27, 4  ;;  %v244_v39 = vrot.slane %v243_v28, 4  ;;  %v2052_v43 = vrot.slane %v2050_v30, 5  ;;  %v254_v46 = vshll.u32 %v176_v31, 16  ;;  %v6539_v1 = vld [vmem:[%s6486_s7 + $0x20] sm:$0x1] }
  0x25   : > { %v2037_v42 = vor.u32 %v2036_v34, %v2033_v33  ;;  %v2047_v49 = vor.u32 %v2046_v40, %v2042_v35  ;;  %v260_v50 = vshll.u32 %v177_v36, 16  ;;  %v253_v53 = vrot.slane %v251_v45, 4  ;;  %v178_v18 = vld [vmem:[%s6486_s7 + $0x18] sm:$0xf]  ;;  %v179_v23 = vld [vmem:[%s6486_s7 + $0x1c] sm:$0xf] }
  0x26   : > { %v239_v47 = vsel %vm6512_vm4, %v234_v38, %v238_v20  ;;  %v249_v48 = vsel %vm6512_vm4, %v244_v39, %v248_v22  ;;  %v256_v54 = vrot.slane %v254_v46, 5  ;;  %v264_v58 = vshrl.u32 %v177_v36, 16  ;;  %v209_v31 = vld [vmem:[%s6486_s7 + $0x20] sm:$0x1]  ;;  %v5060_v40 = vld [vmem:[%s6486_s7 + $0x24] sm:$0xf] }
  0x27   : > { %v4876_v51 = vcombine.low %v239_v47, %v249_v48  ;;  %v2038_v52 = vrot.slane %v2037_v42, 4  ;;  %v2048_v56 = vrot.slane %v2047_v49, 4  ;;  %v262_v57 = vrot.slane %v260_v50, 5  ;;  %v6562_v46 = vld [vmem:[%s6486_s7 + $0x28] sm:$0xf]  ;;  %s4873_s5 = sshll.u32 %s161_s4, 8 }
  0x28   : > { %v270_v59 = vshll.u32 %v208_v44, 16  ;;  %v2774_v62 = vrot.slane %v6493_v15, 5  ;;  %v2777_v63 = vrot.slane %v6496_v16, 5  ;;  %v257_v0 = vor.u32 %v256_v54, %v253_v53  ;;  %v6571_v54 = vld [vmem:[%s6486_s7 + $0x2c] sm:$0x1]  ;;  %s8165_s6 = scalar_lea.vmem [#allocation2], %s4873_s5 }
  0x29   : > { %5572 = vmatprep.mubr.msk.bf16.mxu1 %vm660_vm3, %v4876_v51  ;;  %v2043_v61 = vsel %vm6512_vm4, %v2038_v52, %v2042_v35  ;;  %v2053_v2 = vsel %vm6512_vm4, %v2048_v56, %v2052_v43  ;;  %v266_v4 = vrot.slane %v264_v58, 4  ;;  %v2055_v6 = vshrl.u32 %v5057_v55, 16  ;;  %v4956_v51 = vld [vmem:[%s8257_s1 + $0x4] sm:$0x3]  ;;  %v6771_v16 = vld [vmem:[%s6486_s7 + $0x7c] sm:$0xf] }
  0x2a   : > { %v272_v5 = vrot.slane %v270_v59, 5  ;;  %v5103_v7 = vcombine.low %v2043_v61, %v2053_v2  ;;  %v258_v8 = vrot.slane %v257_v0, 4  ;;  %v2058_v9 = vshll.u32 %v5057_v55, 16  ;;  %v180_v0 = vld [vmem:[%s6486_s7 + $0x24] sm:$0xf]  ;;  %s4780_s8 = sshll.u32 %s8165_s6, 4  ;;  %s8203_s8 = int_to_ptr.vmem [resolvable:$true] %s4780_s8 }
  0x2b   : > { %v2064_v10 = vshll.u32 %v6531_v60, 16  ;;  %v267_v11 = vor.u32 %v266_v4, %v262_v57  ;;  %v2057_v12 = vrot.slane %v2055_v6, 4  ;;  %v2068_v13 = vshrl.u32 %v6531_v60, 16  ;;  %s6307_s20 = scalar_lea.vmem %s8203_s8, 4096  ;;  %s6313_s25 = scalar_lea.vmem %s6312_s24, 8192 }
  0x2c   : > { %v2074_v14 = vshll.u32 %v6539_v1, 16  ;;  %5708 = vmatprep.mubr.msk.bf16.mxu0 %vm660_vm3, %v5103_v7  ;;  %v263_v19 = vsel %vm6512_vm4, %v258_v8, %v262_v57  ;;  %v2060_v20 = vrot.slane %v2058_v9, 5  ;;  %v2781_v22 = vrot.slane %v6531_v60, 5  ;;  %v181_v7 = vld [vmem:[%s6486_s7 + $0x28] sm:$0xf]  ;;  %p6308_p12 = scmp.ne.s32.totalorder %s8203_s8, %s6307_s20  ;;  %p6314_p1 = scmp.lt.s32.totalorder %s8203_s8, %s6312_s24 }
  0x2d   : > { %v2066_v21 = vrot.slane %v2064_v10, 5  ;;  %v268_v24 = vrot.slane %v267_v11, 4  ;;  %v2070_v25 = vrot.slane %v2068_v13, 4  ;;  %v2784_v28 = vrot.slane %v6539_v1, 5  ;;  %v210_v13 = vld [vmem:[%s6486_s7 + $0x2c] sm:$0x1]  ;;  %p6315_p2 = scmp.lt.s32.totalorder %s6313_s25, %s6307_s20 }
  0x2e   : > { %v2076_v27 = vrot.slane %v2074_v14, 5  ;;  %v2061_v29 = vor.u32 %v2060_v20, %v2057_v12  ;;  %v6555_v30 = vrot.slane %v2781_v22, 4  ;;  %v275_v33 = vshrl.u32 %v178_v18, 16  ;;  %p6309_p13 = pnand %p6308_p12, %p6445_p4 }
  0x2f   : > { %v278_v34 = vshll.u32 %v178_v18, 16  ;;  %v273_v35 = vsel %vm6512_vm4, %v268_v24, %v272_v5  ;;  %v2071_v36 = vor.u32 %v2070_v25, %v2066_v21  ;;  %v284_v38 = vshll.u32 %v179_v23, 16  ;;  %v5063_v24 = vld [vmem:[%s6486_s7 + $0x30] sm:$0xf]  ;;  %p6316_p3 = por %p6315_p2, %p6314_p1 }
  0x30   : > { %v288_v39 = vshrl.u32 %v179_v23, 16  ;;  %v4877_v42 = vcombine.low %v263_v19, %v273_v35  ;;  %v2062_v43 = vrot.slane %v2061_v29, 4  ;;  %v277_v44 = vrot.slane %v275_v33, 4  ;;  %v6591_v33 = vld [vmem:[%s6486_s7 + $0x34] sm:$0xf]  ;;  %p6310_p0 = pneg %p6309_p13 }
  0x31   : > { %v280_v45 = vrot.slane %v278_v34, 5  ;;  %v2072_v47 = vrot.slane %v2071_v36, 4  ;;  %v286_v48 = vrot.slane %v284_v38, 5  ;;  %v294_v50 = vshll.u32 %v209_v31, 16 }
  0x32   : > { %v290_v49 = vrot.slane %v288_v39, 4  ;;  %5573 = vmatmul.mubr.msk.bf16.vlgmr.msra.gmra.mrb[0].mxu1 %vm660_vm3, %v4877_v42  ;;  %v2067_v52 = vsel %vm6512_vm4, %v2062_v43, %v2066_v21  ;;  %v2079_v55 = vshrl.u32 %v5060_v40, 16  ;;  %v2082_v56 = vshll.u32 %v5060_v40, 16  ;;  %v6599_v40 = vld [vmem:[%s6486_s7 + $0x38] sm:$0x1]  ;;  %p6317_p5 = pnand %p6316_p3, %p6310_p0 }
  0x33   : > { %v281_v53 = vor.u32 %v280_v45, %v277_v44  ;;  %5605 = vmatpush3.bf16.msra.mxu1 %v6499_v17  ;;  %v2077_v57 = vsel %vm6512_vm4, %v2072_v47, %v2076_v27  ;;  %v296_v59 = vrot.slane %v294_v50, 5  ;;  %v2088_v61 = vshll.u32 %v6562_v46, 16 }
  0x34   : > { %v291_v58 = vor.u32 %v290_v49, %v286_v48  ;;  %v5104_v2 = vcombine.low %v2067_v52, %v2077_v57  ;;  %v2081_v5 = vrot.slane %v2079_v55, 4  ;;  %v2084_v6 = vrot.slane %v2082_v56, 5  ;;  %6136 = vmatprep.subr.msk.bf16.mxu1 %vm709_vm0, %v4956_v51  ;;  %v182_v52 = vld [vmem:[%s6486_s7 + $0x30] sm:$0xf] }
  0x35   : > { %v282_v4 = vrot.slane %v281_v53, 4  ;;  %v2090_v9 = vrot.slane %v2088_v61, 5  ;;  %v2092_v17 = vshrl.u32 %v6562_v46, 16  ;;  %v2098_v10 = vshll.u32 %v6571_v54, 16 }
  0x36   : > { %v292_v8 = vrot.slane %v291_v58, 4  ;;  %5709 = vmatmul.mubr.msk.bf16.vlgmr.msra.gmra.mrb[0].mxu0 %vm660_vm3, %v5104_v2  ;;  %v2085_v12 = vor.u32 %v2084_v6, %v2081_v5  ;;  %v299_v14 = vshrl.u32 %v180_v0, 16  ;;  %v302_v18 = vshll.u32 %v180_v0, 16  ;;  %v183_v58 = vld [vmem:[%s6486_s7 + $0x34] sm:$0xf] }
  0x37   : > { %v287_v11 = vsel %vm6512_vm4, %v282_v4, %v286_v48  ;;  %5741 = vmatpush3.bf16.msra.mxu0 %v6518_v37  ;;  %v2094_v20 = vrot.slane %v2092_v17, 4  ;;  %v2100_v21 = vrot.slane %v2098_v10, 5  ;;  %v308_v23 = vshll.u32 %v181_v7, 16  ;;  %v211_v4 = vld [vmem:[%s6486_s7 + $0x38] sm:$0x1] }
  0x38   : > { %v297_v19 = vsel %vm6512_vm4, %v292_v8, %v296_v59  ;;  %v2086_v27 = vrot.slane %v2085_v12, 4  ;;  %v301_v29 = vrot.slane %v299_v14, 4  ;;  %v304_v31 = vrot.slane %v302_v18, 5  ;;  %6141 = vmatprep.subr.msk.bf16.mxu0 %vm709_vm0, %v6505_v26  ;;  %v5066_v12 = vld [vmem:[%s6486_s7 + $0x3c] sm:$0xf] }
  0x39   : > { %v4878_v25 = vcombine.low %v287_v11, %v297_v19  ;;  %v2095_v34 = vor.u32 %v2094_v20, %v2090_v9  ;;  %v310_v35 = vrot.slane %v308_v23, 5  ;;  %v312_v37 = vshrl.u32 %v181_v7, 16  ;;  %v6616_v20 = vld [vmem:[%s6486_s7 + $0x40] sm:$0xf] }
  0x3a   : > { %v318_v36 = vshll.u32 %v210_v13, 16  ;;  %v2091_v38 = vsel %vm6512_vm4, %v2086_v27, %v2090_v9  ;;  %v305_v39 = vor.u32 %v304_v31, %v301_v29  ;;  %v2103_v42 = vshrl.u32 %v5063_v24, 16 }
  0x3b   : > { %5576 = vmatprep.mubr.msk.bf16.mxu1 %vm660_vm3, %v4878_v25  ;;  %v2106_v43 = vshll.u32 %v5063_v24, 16  ;;  %v2096_v44 = vrot.slane %v2095_v34, 4  ;;  %v314_v45 = vrot.slane %v312_v37, 4  ;;  %v2112_v26 = vshll.u32 %v6591_v33, 16  ;;  %v6621_v34 = vld [vmem:[%s6486_s7 + $0x44] sm:$0x1] }
  0x3c   : > { %v320_v47 = vrot.slane %v318_v36, 5  ;;  %v306_v48 = vrot.slane %v305_v39, 4  ;;  %v2105_v49 = vrot.slane %v2103_v42, 4  ;;  %v2116_v51 = vshrl.u32 %v6591_v33, 16  ;;  %v184_v42 = vld [vmem:[%s6486_s7 + $0x3c] sm:$0xf] }
  0x3d   : > { %v2108_v50 = vrot.slane %v2106_v43, 5  ;;  %v2101_v53 = vsel %vm6512_vm4, %v2096_v44, %v2100_v21  ;;  %v315_v55 = vor.u32 %v314_v45, %v310_v35  ;;  %v2114_v56 = vrot.slane %v2112_v26, 5  ;;  %v185_v26 = vld [vmem:[%s6486_s7 + $0x40] sm:$0xf] }
  0x3e   : > { %v2122_v57 = vshll.u32 %v6599_v40, 16  ;;  %v5105_v59 = vcombine.low %v2091_v38, %v2101_v53  ;;  %v311_v61 = vsel %vm6512_vm4, %v306_v48, %v310_v35  ;;  %v2118_v2 = vrot.slane %v2116_v51, 4 }
  0x3f   : > { %v2109_v0 = vor.u32 %v2108_v50, %v2105_v49  ;;  %v316_v5 = vrot.slane %v315_v55, 4  ;;  %v323_v7 = vshrl.u32 %v182_v52, 16  ;;  %v326_v8 = vshll.u32 %v182_v52, 16 }
  0x40   : > { %v2124_v6 = vrot.slane %v2122_v57, 5  ;;  %5712 = vmatprep.mubr.msk.bf16.mxu0 %vm660_vm3, %v5105_v59  ;;  %v2119_v17 = vor.u32 %v2118_v2, %v2114_v56  ;;  %v332_v10 = vshll.u32 %v183_v58, 16  ;;  %v336_v11 = vshrl.u32 %v183_v58, 16  ;;  %v5069_v2 = vld [vmem:[%s6486_s7 + $0x48] sm:$0xf] }
  0x41   : > { %v2110_v9 = vrot.slane %v2109_v0, 4  ;;  %v321_v13 = vsel %vm6512_vm4, %v316_v5, %v320_v47  ;;  %v325_v14 = vrot.slane %v323_v7, 4  ;;  %v328_v18 = vrot.slane %v326_v8, 5  ;;  %v6639_v8 = vld [vmem:[%s6486_s7 + $0x4c] sm:$0xf] }
  0x42   : > { %v342_v19 = vshll.u32 %v211_v4, 16  ;;  %v4879_v21 = vcombine.low %v311_v61, %v321_v13  ;;  %v2120_v24 = vrot.slane %v2119_v17, 4  ;;  %v334_v25 = vrot.slane %v332_v10, 5  ;;  %v212_v61 = vld [vmem:[%s6486_s7 + $0x44] sm:$0x1] }
  0x43   : > { %v2115_v23 = vsel %vm6512_vm4, %v2110_v9, %v2114_v56  ;;  %v329_v27 = vor.u32 %v328_v18, %v325_v14  ;;  %v338_v29 = vrot.slane %v336_v11, 4  ;;  %v2127_v35 = vshrl.u32 %v5066_v12, 16 }
  0x44   : > { %v344_v31 = vrot.slane %v342_v19, 5  ;;  %5577 = vmatmul.mubr.msk.bf16.gmra.mrb[4].mxu1 %vm660_vm3, %v4879_v21  ;;  %v2125_v37 = vsel %vm6512_vm4, %v2120_v24, %v2124_v6  ;;  %v2130_v36 = vshll.u32 %v5066_v12, 16  ;;  %v2136_v38 = vshll.u32 %v6616_v20, 16 }
  0x45   : > { %v2140_v39 = vshrl.u32 %v6616_v20, 16  ;;  %v5106_v43 = vcombine.low %v2115_v23, %v2125_v37  ;;  %v330_v44 = vrot.slane %v329_v27, 4  ;;  %v339_v45 = vor.u32 %v338_v29, %v334_v25  ;;  %v6647_v23 = vld [vmem:[%s6486_s7 + $0x50] sm:$0x1]  ;;  %v6651_v27 = vld [vmem:[%s6486_s7 + $0x48] sm:$0xf] }
  0x46   : > { %v2129_v47 = vrot.slane %v2127_v35, 4  ;;  %v2132_v48 = vrot.slane %v2130_v36, 5  ;;  %v2138_v49 = vrot.slane %v2136_v38, 5  ;;  %v2146_v51 = vshll.u32 %v6621_v34, 16  ;;  %v6654_v36 = vld [vmem:[%s6486_s7 + $0x4c] sm:$0xf] }
  0x47   : > { %v2142_v50 = vrot.slane %v2140_v39, 4  ;;  %5713 = vmatmul.mubr.msk.bf16.gmra.mrb[4].mxu0 %vm660_vm3, %v5106_v43  ;;  %v335_v52 = vsel %vm6512_vm4, %v330_v44, %v334_v25  ;;  %v340_v53 = vrot.slane %v339_v45, 4  ;;  %v347_v55 = vshrl.u32 %v184_v42, 16 }
  0x48   : > { %v350_v56 = vshll.u32 %v184_v42, 16  ;;  %v2133_v57 = vor.u32 %v2132_v48, %v2129_v47  ;;  %v2148_v59 = vrot.slane %v2146_v51, 5  ;;  %v356_v0 = vshll.u32 %v185_v26, 16 }
  0x49   : > { %v2143_v58 = vor.u32 %v2142_v50, %v2138_v49  ;;  %v345_v4 = vsel %vm6512_vm4, %v340_v53, %v344_v31  ;;  %v349_v5 = vrot.slane %v347_v55, 4  ;;  %v360_v7 = vshrl.u32 %v185_v26, 16  ;;  %v213_v26 = vld [vmem:[%s6486_s7 + $0x50] sm:$0x1]  ;;  %v5072_v53 = vld [vmem:[%s6486_s7 + $0x54] sm:$0xf] }
  0x4a   : > { %v352_v6 = vrot.slane %v350_v56, 5  ;;  %v4880_v9 = vcombine.low %v335_v52, %v345_v4  ;;  %v2134_v17 = vrot.slane %v2133_v57, 4  ;;  %v358_v11 = vrot.slane %v356_v0, 5  ;;  %v6670_v4 = vld [vmem:[%s6486_s7 + $0x58] sm:$0xf] }
  0x4b   : > { %v2144_v10 = vrot.slane %v2143_v58, 4  ;;  %v362_v13 = vrot.slane %v360_v7, 4  ;;  %v366_v14 = vshll.u32 %v212_v61, 16  ;;  %v2151_v18 = vshrl.u32 %v5069_v2, 16 }
  0x4c   : > { %v353_v12 = vor.u32 %v352_v6, %v349_v5  ;;  %5580 = vmatprep.mubr.msk.bf16.mxu1 %vm660_vm3, %v4880_v9  ;;  %v2139_v19 = vsel %vm6512_vm4, %v2134_v17, %v2138_v49  ;;  %v2154_v24 = vshll.u32 %v5069_v2, 16  ;;  %v2160_v25 = vshll.u32 %v6639_v8, 16 }
  0x4d   : > { %v2149_v21 = vsel %vm6512_vm4, %v2144_v10, %v2148_v59  ;;  %v363_v35 = vor.u32 %v362_v13, %v358_v11  ;;  %v368_v37 = vrot.slane %v366_v14, 5  ;;  %v2153_v38 = vrot.slane %v2151_v18, 4 }
  0x4e   : > { %v5107_v29 = vcombine.low %v2139_v19, %v2149_v21  ;;  %v354_v31 = vrot.slane %v353_v12, 4  ;;  %v2156_v39 = vrot.slane %v2154_v24, 5  ;;  %v2162_v42 = vrot.slane %v2160_v25, 5  ;;  %v6676_v12 = vld [vmem:[%s6486_s7 + $0x5c] sm:$0x1] }
  0x4f   : > { %v2164_v43 = vshrl.u32 %v6639_v8, 16  ;;  %v364_v45 = vrot.slane %v363_v35, 4  ;;  %v2170_v47 = vshll.u32 %v6647_v23, 16  ;;  %v371_v48 = vshrl.u32 %v6651_v27, 16  ;;  %v6680_v24 = vld [vmem:[%s6486_s7 + $0x54] sm:$0xf] }
  0x50   : > { %5716 = vmatprep.mubr.msk.bf16.mxu0 %vm660_vm3, %v5107_v29  ;;  %v359_v44 = vsel %vm6512_vm4, %v354_v31, %v358_v11  ;;  %v2157_v49 = vor.u32 %v2156_v39, %v2153_v38  ;;  %v374_v51 = vshll.u32 %v6651_v27, 16  ;;  %v380_v52 = vshll.u32 %v6654_v36, 16 }
  0x51   : > { %v2166_v50 = vrot.slane %v2164_v43, 4  ;;  %v369_v55 = vsel %vm6512_vm4, %v364_v45, %v368_v37  ;;  %v2172_v56 = vrot.slane %v2170_v47, 5  ;;  %v373_v57 = vrot.slane %v371_v48, 4  ;;  %v6686_v37 = vld [vmem:[%s6486_s7 + $0x58] sm:$0xf] }
  0x52   : > { %v384_v58 = vshrl.u32 %v6654_v36, 16  ;;  %v4881_v59 = vcombine.low %v359_v44, %v369_v55  ;;  %v2158_v61 = vrot.slane %v2157_v49, 4  ;;  %v376_v2 = vrot.slane %v374_v51, 5 }
  0x53   : > { %v2167_v0 = vor.u32 %v2166_v50, %v2162_v42  ;;  %v382_v5 = vrot.slane %v380_v52, 5  ;;  %v390_v7 = vshll.u32 %v213_v26, 16  ;;  %v2175_v9 = vshrl.u32 %v5072_v53, 16  ;;  %v214_v26 = vld [vmem:[%s6486_s7 + $0x5c] sm:$0x1] }
  0x54   : > { %v386_v6 = vrot.slane %v384_v58, 4  ;;  %5581 = vmatmul.mubr.msk.bf16.gmra.mrb[8].mxu1 %vm660_vm3, %v4881_v59  ;;  %v2163_v17 = vsel %vm6512_vm4, %v2158_v61, %v2162_v42  ;;  %v377_v11 = vor.u32 %v376_v2, %v373_v57  ;;  %v2178_v13 = vshll.u32 %v5072_v53, 16  ;;  %v5075_v53 = vld [vmem:[%s6486_s7 + $0x60] sm:$0xf]  ;;  %v6700_v59 = vld [vmem:[%s6486_s7 + $0x64] sm:$0xf] }
  0x55   : > { %v2168_v10 = vrot.slane %v2167_v0, 4  ;;  %v392_v18 = vrot.slane %v390_v7, 5  ;;  %v2177_v19 = vrot.slane %v2175_v9, 4  ;;  %v2184_v21 = vshll.u32 %v6670_v4, 16  ;;  %v6707_v9 = vld [vmem:[%s6486_s7 + $0x68] sm:$0x1] }
  0x56   : > { %v387_v14 = vor.u32 %v386_v6, %v382_v5  ;;  %v378_v29 = vrot.slane %v377_v11, 4  ;;  %v2180_v31 = vrot.slane %v2178_v13, 5  ;;  %v2188_v35 = vshrl.u32 %v6670_v4, 16 }
  0x57   : > { %v2173_v25 = vsel %vm6512_vm4, %v2168_v10, %v2172_v56  ;;  %v2186_v42 = vrot.slane %v2184_v21, 5  ;;  %v2194_v43 = vshll.u32 %v6676_v12, 16  ;;  %v395_v48 = vshrl.u32 %v6680_v24, 16 }
  0x58   : > { %v5108_v38 = vcombine.low %v2163_v17, %v2173_v25  ;;  %v388_v39 = vrot.slane %v387_v14, 4  ;;  %v383_v44 = vsel %vm6512_vm4, %v378_v29, %v382_v5  ;;  %v2181_v45 = vor.u32 %v2180_v31, %v2177_v19  ;;  %v6711_v19 = vld [vmem:[%s6486_s7 + $0x60] sm:$0xf] }
  0x59   : > { %v2190_v47 = vrot.slane %v2188_v35, 4  ;;  %v2196_v50 = vrot.slane %v2194_v43, 5  ;;  %v398_v51 = vshll.u32 %v6680_v24, 16  ;;  %v404_v52 = vshll.u32 %v6686_v37, 16  ;;  %v6717_v35 = vld [vmem:[%s6486_s7 + $0x64] sm:$0xf] }
  0x5a   : > { %5717 = vmatmul.mubr.msk.bf16.gmra.mrb[8].mxu0 %vm660_vm3, %v5108_v38  ;;  %v393_v49 = vsel %vm6512_vm4, %v388_v39, %v392_v18  ;;  %v2182_v56 = vrot.slane %v2181_v45, 4  ;;  %v397_v58 = vrot.slane %v395_v48, 4  ;;  %v408_v2 = vshrl.u32 %v6686_v37, 16 }
  0x5b   : > { %v4882_v55 = vcombine.low %v383_v44, %v393_v49  ;;  %v2191_v57 = vor.u32 %v2190_v47, %v2186_v42  ;;  %v400_v61 = vrot.slane %v398_v51, 5  ;;  %v406_v0 = vrot.slane %v404_v52, 5 }
  0x5c   : > { %v414_v5 = vshll.u32 %v214_v26, 16  ;;  %v2187_v6 = vsel %vm6512_vm4, %v2182_v56, %v2186_v42  ;;  %v2199_v17 = vshrl.u32 %v5075_v53, 16  ;;  %v2202_v10 = vshll.u32 %v5075_v53, 16 }
  0x5d   : > { %5584 = vmatprep.mubr.msk.bf16.mxu1 %vm660_vm3, %v4882_v55  ;;  %v2192_v7 = vrot.slane %v2191_v57, 4  ;;  %v401_v11 = vor.u32 %v400_v61, %v397_v58  ;;  %v410_v13 = vrot.slane %v408_v2, 4  ;;  %v2208_v18 = vshll.u32 %v6700_v59, 16  ;;  %v5135_v58 = vld [vmem:[%s6486_s7 + $0xc] sm:$0xe] }
  0x5e   : > { %v416_v14 = vrot.slane %v414_v5, 5  ;;  %v2201_v25 = vrot.slane %v2199_v17, 4  ;;  %v2204_v29 = vrot.slane %v2202_v10, 5  ;;  %v2212_v31 = vshrl.u32 %v6700_v59, 16 }
  0x5f   : > { %v2197_v21 = vsel %vm6512_vm4, %v2192_v7, %v2196_v50  ;;  %v402_v39 = vrot.slane %v401_v11, 4  ;;  %v411_v42 = vor.u32 %v410_v13, %v406_v0  ;;  %v2210_v43 = vrot.slane %v2208_v18, 5  ;;  %v215_v50 = vld [vmem:[%s6486_s7 + $0x68] sm:$0x1] }
  0x60   : > { %v5109_v38 = vcombine.low %v2187_v6, %v2197_v21  ;;  %v2205_v44 = vor.u32 %v2204_v29, %v2201_v25  ;;  %v2214_v45 = vrot.slane %v2212_v31, 4  ;;  %v2218_v47 = vshll.u32 %v6707_v9, 16  ;;  %v6745_v29 = vld [vmem:[%s6486_s7 + $0x70] sm:$0xf] }
  0x61   : > { %v419_v26 = vshrl.u32 %v6711_v19, 16  ;;  %v407_v48 = vsel %vm6512_vm4, %v402_v39, %v406_v0  ;;  %v412_v49 = vrot.slane %v411_v42, 4  ;;  %v422_v51 = vshll.u32 %v6711_v19, 16  ;;  %v6732_v0 = vld [vmem:[%s6486_s7 + $0x6c] sm:$0xf] }
  0x62   : > { %5720 = vmatprep.mubr.msk.bf16.mxu0 %vm660_vm3, %v5109_v38  ;;  %v428_v52 = vshll.u32 %v6717_v35, 16  ;;  %v2206_v53 = vrot.slane %v2205_v44, 4  ;;  %v2215_v55 = vor.u32 %v2214_v45, %v2210_v43  ;;  %v2220_v56 = vrot.slane %v2218_v47, 5 }
  0x63   : > { %v421_v57 = vrot.slane %v419_v26, 4  ;;  %v417_v61 = vsel %vm6512_vm4, %v412_v49, %v416_v14  ;;  %v424_v2 = vrot.slane %v422_v51, 5  ;;  %v432_v6 = vshrl.u32 %v6717_v35, 16  ;;  %v216_v26 = vld [vmem:[%s6486_s7 + $0x74] sm:$0x1] }
  0x64   : > { %v430_v5 = vrot.slane %v428_v52, 5  ;;  %v4883_v7 = vcombine.low %v407_v48, %v417_v61  ;;  %v2211_v17 = vsel %vm6512_vm4, %v2206_v53, %v2210_v43  ;;  %v2216_v10 = vrot.slane %v2215_v55, 4  ;;  %v5136_v48 = vld [vmem:[%s6486_s7 + $0x18] sm:$0xe] }
  0x65   : > { %v438_v11 = vshll.u32 %v215_v50, 16  ;;  %v425_v14 = vor.u32 %v424_v2, %v421_v57  ;;  %v434_v18 = vrot.slane %v432_v6, 4  ;;  %v5151_v21 = vrot.slane %v5135_v58, 9  ;;  %v6764_v53 = vld [vmem:[%s6486_s7 + $0x78] sm:$0xf] }
  0x66   : > { %v2776_v25 = vrot.slane %v2774_v62, 4  ;;  %5585 = vmatmul.mubr.msk.bf16.gmra.mrb[12].mxu1 %vm660_vm3, %v4883_v7  ;;  %v2221_v31 = vsel %vm6512_vm4, %v2216_v10, %v2220_v56  ;;  %v443_v39 = vshrl.u32 %v6732_v0, 16  ;;  %v446_v42 = vshll.u32 %v6732_v0, 16  ;;  %v217_v57 = vld [vmem:[%s6486_s7 + $0x80] sm:$0x1] }
  0x67   : > { %v440_v38 = vrot.slane %v438_v11, 5  ;;  %v5110_v43 = vcombine.low %v2211_v17, %v2221_v31  ;;  %v426_v44 = vrot.slane %v425_v14, 4  ;;  %v435_v45 = vor.u32 %v434_v18, %v430_v5  ;;  %v5137_v10 = vld [vmem:[%s6486_s7 + $0x24] sm:$0xe] }
  0x68   : > { %v2775_v47 = vsel %vm6738_vm7, %v5151_v21, %v2774_v62  ;;  %v2778_v49 = vsel %vm6738_vm7, %v2776_v25, %v2777_v63  ;;  %v445_v50 = vrot.slane %v443_v39, 4  ;;  %v448_v51 = vrot.slane %v446_v42, 5  ;;  %v6790_v39 = vld [vmem:[%s6486_s7 + $0x84] sm:$0xf] }
  0x69   : > { %v452_v52 = vshll.u32 %v6745_v29, 16  ;;  %5721 = vmatmul.mubr.msk.bf16.gmra.mrb[12].mxu0 %vm660_vm3, %v5110_v43  ;;  %v431_v15 = vsel %vm6512_vm4, %v426_v44, %v430_v5  ;;  %v436_v62 = vrot.slane %v435_v45, 4  ;;  %v5168_v55 = vcombine.low %v2775_v47, %v2778_v49  ;;  %v6798_v43 = vld [vmem:[%s6486_s7 + $0x88] sm:$0xf] }
  0x6a   : > { %v456_v56 = vshrl.u32 %v6745_v29, 16  ;;  %v449_v63 = vor.u32 %v448_v51, %v445_v50  ;;  %v462_v61 = vshll.u32 %v216_v26, 16  ;;  %v5152_v2 = vrot.slane %v5136_v48, 9 }
  0x6b   : > { %v454_v58 = vrot.slane %v452_v52, 5  ;;  %v441_v6 = vsel %vm6512_vm4, %v436_v62, %v440_v38  ;;  %5742 = vmatprep.mubr.msk.bf16.mxu0 %vm660_vm3, %v5168_v55  ;;  %v2785_v5 = vsel %vm6738_vm7, %v6555_v30, %v2784_v28  ;;  %v467_v17 = vshrl.u32 %v6764_v53, 16  ;;  %v218_v52 = vld [vmem:[%s6486_s7 + $0x8c] sm:$0x1] }
  0x6c   : > { %v458_v7 = vrot.slane %v456_v56, 4  ;;  %v4884_v11 = vcombine.low %v431_v15, %v441_v6  ;;  %v450_v14 = vrot.slane %v449_v63, 4  ;;  %v464_v18 = vrot.slane %v462_v61, 5 }
  0x6d   : > { %v2782_v21 = vsel %vm6738_vm7, %v5152_v2, %v2781_v22  ;;  %v469_v38 = vrot.slane %v467_v17, 4  ;;  %v470_v1 = vshll.u32 %v6764_v53, 16  ;;  %v476_v30 = vshll.u32 %v6771_v16, 16  ;;  %v6803_v22 = vld [vmem:[%s8257_s1 + $0xe] sm:$0x3] }
  0x6e   : > { %v459_v25 = vor.u32 %v458_v7, %v454_v58  ;;  %v5169_v31 = vcombine.low %v2782_v21, %v2785_v5  ;;  %5588 = vmatprep.mubr.msk.bf16.mxu1 %vm660_vm3, %v4884_v11  ;;  %v455_v28 = vsel %vm6512_vm4, %v450_v14, %v454_v58  ;;  %v480_v60 = vshrl.u32 %v6771_v16, 16  ;;  %v6822_v5 = vld [vmem:[%s6486_s7 + $0x90] sm:$0xf] }
  0x6f   : > { %v486_v42 = vshll.u32 %v217_v57, 16  ;;  %v472_v45 = vrot.slane %v470_v1, 5  ;;  %v5153_v47 = vrot.slane %v5137_v10, 9  ;;  %v2788_v26 = vrot.slane %v6562_v46, 5  ;;  %v5138_v57 = vld [vmem:[%s6486_s7 + $0x30] sm:$0xe] }
  0x70   : > { %v460_v44 = vrot.slane %v459_v25, 4  ;;  %v478_v48 = vrot.slane %v476_v30, 5  ;;  %v482_v49 = vrot.slane %v480_v60, 4  ;;  %v2791_v51 = vrot.slane %v6571_v54, 5  ;;  %v6834_v30 = vld [vmem:[%s6486_s7 + $0x94] sm:$0xf] }
  0x71   : > { %v488_v50 = vrot.slane %v486_v42, 5  ;;  %5743 = vmatmul.mubr.msk.bf16.vlgmr.msra.gmra.mrb[0].mxu0 %vm660_vm3, %v5169_v31  ;;  %v473_v62 = vor.u32 %v472_v45, %v469_v38  ;;  %v2789_v55 = vsel %vm6738_vm7, %v5153_v47, %v2788_v26  ;;  %v2790_v56 = vrot.slane %v2788_v26, 4  ;;  %v219_v60 = vld [vmem:[%s6486_s7 + $0x98] sm:$0x1]  ;;  %v5139_v26 = vld [vmem:[%s6486_s7 + $0x3c] sm:$0xe] }
  0x72   : > { %v465_v15 = vsel %vm6512_vm4, %v460_v44, %v464_v18  ;;  %5775 = vmatpush3.bf16.msra.mxu0 %v6522_v41  ;;  %v483_v46 = vor.u32 %v482_v49, %v478_v48  ;;  %v491_v58 = vshrl.u32 %v6790_v39, 16  ;;  %v494_v54 = vshll.u32 %v6790_v39, 16 }
  0x73   : > { %v4885_v63 = vcombine.low %v455_v28, %v465_v15  ;;  %v474_v61 = vrot.slane %v473_v62, 4  ;;  %v2792_v2 = vsel %vm6738_vm7, %v2790_v56, %v2791_v51  ;;  %v500_v6 = vshll.u32 %v6798_v43, 16  ;;  %6142 = vmatprep.subr.msk.bf16.mxu0 %vm709_vm0, %v6803_v22 }
  0x74   : > { %v504_v7 = vshrl.u32 %v6798_v43, 16  ;;  %v484_v41 = vrot.slane %v483_v46, 4  ;;  %v5170_v17 = vcombine.low %v2789_v55, %v2792_v2  ;;  %v493_v10 = vrot.slane %v491_v58, 4  ;;  %v6854_v46 = vld [vmem:[%s6486_s7 + $0xa0] sm:$0xf] }
  0x75   : > { %5589 = vmatmul.mubr.msk.bf16.gmra.mrb[16].mxu1 %vm660_vm3, %v4885_v63  ;;  %v496_v11 = vrot.slane %v494_v54, 5  ;;  %v479_v14 = vsel %vm6512_vm4, %v474_v61, %v478_v48  ;;  %v502_v18 = vrot.slane %v500_v6, 5  ;;  %v510_v25 = vshll.u32 %v218_v52, 16  ;;  %v6843_v52 = vld [vmem:[%s6486_s7 + $0x9c] sm:$0xf] }
  0x76   : > { %v506_v21 = vrot.slane %v504_v7, 4  ;;  %v489_v31 = vsel %vm6512_vm4, %v484_v41, %v488_v50  ;;  %5746 = vmatprep.mubr.msk.bf16.mxu0 %vm660_vm3, %v5170_v17  ;;  %v5154_v1 = vrot.slane %v5138_v57, 9  ;;  %v2795_v28 = vrot.slane %v6591_v33, 5 }
  0x77   : > { %v497_v38 = vor.u32 %v496_v11, %v493_v10  ;;  %v4886_v42 = vcombine.low %v479_v14, %v489_v31  ;;  %v512_v45 = vrot.slane %v510_v25, 5  ;;  %v2798_v47 = vrot.slane %v6599_v40, 5  ;;  %v220_v10 = vld [vmem:[%s6486_s7 + $0xa4] sm:$0x1]  ;;  %v5140_v11 = vld [vmem:[%s6486_s7 + $0x48] sm:$0xe] }
  0x78   : > { %v507_v44 = vor.u32 %v506_v21, %v502_v18  ;;  %v2796_v49 = vsel %vm6738_vm7, %v5154_v1, %v2795_v28  ;;  %v2797_v50 = vrot.slane %v2795_v28, 4  ;;  %v515_v51 = vshrl.u32 %v6822_v5, 16 }
  0x79   : > { %v498_v48 = vrot.slane %v497_v38, 4  ;;  %5592 = vmatprep.mubr.msk.bf16.mxu1 %vm660_vm3, %v4886_v42  ;;  %v518_v15 = vshll.u32 %v6822_v5, 16  ;;  %v524_v62 = vshll.u32 %v6834_v30, 16  ;;  %v528_v40 = vshrl.u32 %v6834_v30, 16 }
  0x7a   : > { %v508_v33 = vrot.slane %v507_v44, 4  ;;  %v2799_v56 = vsel %vm6738_vm7, %v2797_v50, %v2798_v47  ;;  %v517_v57 = vrot.slane %v515_v51, 4  ;;  %v534_v63 = vshll.u32 %v219_v60, 16 }
  0x7b   : > { %v503_v55 = vsel %vm6512_vm4, %v498_v48, %v502_v18  ;;  %v5171_v54 = vcombine.low %v2796_v49, %v2799_v56  ;;  %v520_v61 = vrot.slane %v518_v15, 5  ;;  %v526_v2 = vrot.slane %v524_v62, 5  ;;  %v6880_v56 = vld [vmem:[%s6486_s7 + $0xac] sm:$0xf] }
  0x7c   : > { %v513_v58 = vsel %vm6512_vm4, %v508_v33, %v512_v45  ;;  %v530_v7 = vrot.slane %v528_v40, 4  ;;  %v536_v41 = vrot.slane %v534_v63, 5  ;;  %v5155_v17 = vrot.slane %v5139_v26, 9  ;;  %v6875_v33 = vld [vmem:[%s6486_s7 + $0xa8] sm:$0xf] }
  0x7d   : > { %v4887_v6 = vcombine.low %v503_v55, %v513_v58  ;;  %5747 = vmatmul.mubr.msk.bf16.gmra.mrb[4].mxu0 %vm660_vm3, %v5171_v54  ;;  %v521_v14 = vor.u32 %v520_v61, %v517_v57  ;;  %v2802_v18 = vrot.slane %v6616_v20, 5  ;;  %v2805_v21 = vrot.slane %v6621_v34, 5  ;;  %v221_v61 = vld [vmem:[%s6486_s7 + $0xb0] sm:$0x1] }
  0x7e   : > { %v539_v25 = vshrl.u32 %v6843_v52, 16  ;;  %v531_v31 = vor.u32 %v530_v7, %v526_v2  ;;  %v542_v38 = vshll.u32 %v6843_v52, 16  ;;  %v548_v1 = vshll.u32 %v6854_v46, 16 }
  0x7f   : > { %5593 = vmatmul.mubr.msk.bf16.gmra.mrb[20].mxu1 %vm660_vm3, %v4887_v6  ;;  %v552_v28 = vshrl.u32 %v6854_v46, 16  ;;  %v522_v60 = vrot.slane %v521_v14, 4  ;;  %v2803_v42 = vsel %vm6738_vm7, %v5155_v17, %v2802_v18  ;;  %v2804_v20 = vrot.slane %v2802_v18, 4  ;;  %v6895_v14 = vld [vmem:[%s6486_s7 + $0xb4] sm:$0xf] }
  0x80   : > { %v541_v44 = vrot.slane %v539_v25, 4  ;;  %v532_v34 = vrot.slane %v531_v31, 4  ;;  %v544_v45 = vrot.slane %v542_v38, 5  ;;  %v550_v47 = vrot.slane %v548_v1, 5 }
  0x81   : > { %v554_v26 = vrot.slane %v552_v28, 4  ;;  %v527_v48 = vsel %vm6512_vm4, %v522_v60, %v526_v2  ;;  %v2806_v49 = vsel %vm6738_vm7, %v2804_v20, %v2805_v21  ;;  %v558_v50 = vshll.u32 %v220_v10, 16  ;;  %v5141_v2 = vld [vmem:[%s6486_s7 + $0x54] sm:$0xe] }
  0x82   : > { %v5156_v51 = vrot.slane %v5140_v11, 9  ;;  %v537_v15 = vsel %vm6512_vm4, %v532_v34, %v536_v41  ;;  %v5172_v62 = vcombine.low %v2803_v42, %v2806_v49  ;;  %v545_v40 = vor.u32 %v544_v45, %v541_v44  ;;  %v6904_v42 = vld [vmem:[%s6486_s7 + $0xb8] sm:$0xf]  ;;  %v222_v49 = vld [vmem:[%s6486_s7 + $0xbc] sm:$0x1] }
  0x83   : > { %v555_v55 = vor.u32 %v554_v26, %v550_v47  ;;  %v4888_v57 = vcombine.low %v527_v48, %v537_v15  ;;  %v560_v63 = vrot.slane %v558_v50, 5  ;;  %v2809_v58 = vrot.slane %v6639_v8, 5 }
  0x84   : > { %v2812_v54 = vrot.slane %v6647_v23, 5  ;;  %5750 = vmatprep.mubr.msk.bf16.mxu0 %vm660_vm3, %v5172_v62  ;;  %v546_v6 = vrot.slane %v545_v40, 4  ;;  %v563_v41 = vshrl.u32 %v6875_v33, 16  ;;  %v566_v17 = vshll.u32 %v6875_v33, 16 }
  0x85   : > { %v556_v7 = vrot.slane %v555_v55, 4  ;;  %5596 = vmatprep.mubr.msk.bf16.mxu1 %vm660_vm3, %v4888_v57  ;;  %v2810_v10 = vsel %vm6738_vm7, %v5156_v51, %v2809_v58  ;;  %v2811_v11 = vrot.slane %v2809_v58, 4  ;;  %v572_v8 = vshll.u32 %v6880_v56, 16  ;;  %v5142_v55 = vld [vmem:[%s6486_s7 + $0x60] sm:$0xe] }
  0x86   : > { %v576_v23 = vshrl.u32 %v6880_v56, 16  ;;  %v551_v18 = vsel %vm6512_vm4, %v546_v6, %v550_v47  ;;  %v565_v25 = vrot.slane %v563_v41, 4  ;;  %v568_v31 = vrot.slane %v566_v17, 5  ;;  %v5143_v6 = vld [vmem:[%s6486_s7 + $0x6c] sm:$0xe] }
  0x87   : > { %v561_v21 = vsel %vm6512_vm4, %v556_v7, %v560_v63  ;;  %v2813_v1 = vsel %vm6738_vm7, %v2811_v11, %v2812_v54  ;;  %v574_v28 = vrot.slane %v572_v8, 5  ;;  %v582_v34 = vshll.u32 %v221_v61, 16  ;;  %v5079_v11 = vld [vmem:[%s6486_s7 + $0x70] sm:$0xf]  ;;  %v5080_v8 = vld [vmem:[%s6486_s7 + $0x74] sm:$0x1] }
  0x88   : > { %v4889_v38 = vcombine.low %v551_v18, %v561_v21  ;;  %v578_v60 = vrot.slane %v576_v23, 4  ;;  %v5173_v20 = vcombine.low %v2810_v10, %v2813_v1  ;;  %v569_v44 = vor.u32 %v568_v31, %v565_v25 }
  0x89   : > { %v5157_v45 = vrot.slane %v5141_v2, 9  ;;  %v2816_v26 = vrot.slane %v6670_v4, 5  ;;  %v2819_v48 = vrot.slane %v6676_v12, 5  ;;  %v587_v50 = vshrl.u32 %v6895_v14, 16 }
  0x8a   : > { %5597 = vmatmul.mubr.msk.bf16.gmra.mrb[24].mxu1 %vm660_vm3, %v4889_v38  ;;  %v579_v47 = vor.u32 %v578_v60, %v574_v28  ;;  %5751 = vmatmul.mubr.msk.bf16.gmra.mrb[8].mxu0 %vm660_vm3, %v5173_v20  ;;  %v570_v51 = vrot.slane %v569_v44, 4  ;;  %v584_v15 = vrot.slane %v582_v34, 5  ;;  %v590_v62 = vshll.u32 %v6895_v14, 16 }
  0x8b   : > { %v596_v40 = vshll.u32 %v6904_v42, 16  ;;  %v2817_v4 = vsel %vm6738_vm7, %v5157_v45, %v2816_v26  ;;  %v2818_v12 = vrot.slane %v2816_v26, 4  ;;  %v589_v63 = vrot.slane %v587_v50, 4 }
  0x8c   : > { %v580_v57 = vrot.slane %v579_v47, 4  ;;  %v575_v58 = vsel %vm6512_vm4, %v570_v51, %v574_v28  ;;  %v592_v54 = vrot.slane %v590_v62, 5  ;;  %v600_v2 = vshrl.u32 %v6904_v42, 16  ;;  %v5144_v47 = vld [vmem:[%s6486_s7 + $0x78] sm:$0xe] }
  0x8d   : > { %v598_v61 = vrot.slane %v596_v40, 5  ;;  %v2820_v41 = vsel %vm6738_vm7, %v2818_v12, %v2819_v48  ;;  %v606_v17 = vshll.u32 %v222_v49, 16  ;;  %v5158_v10 = vrot.slane %v5142_v55, 9  ;;  %v6250_v51 = vld [vmem:[%s6486_s7] sm:$0xf] }
  0x8e   : > { %v585_v7 = vsel %vm6512_vm4, %v580_v57, %v584_v15  ;;  %v5174_v18 = vcombine.low %v2817_v4, %v2820_v41  ;;  %v593_v21 = vor.u32 %v592_v54, %v589_v63  ;;  %v602_v25 = vrot.slane %v600_v2, 4  ;;  %v6942_v15 = vld [vmem:[%s6486_s7 + $0x4] sm:$0xf]  ;;  %v6946_v40 = vld [vmem:[%s6486_s7 + $0x7c] sm:$0xf] }
  0x8f   : > { %v4890_v23 = vcombine.low %v575_v58, %v585_v7  ;;  %v608_v31 = vrot.slane %v606_v17, 5  ;;  %v2823_v38 = vrot.slane %v6700_v59, 5  ;;  %v2826_v1 = vrot.slane %v6707_v9, 5  ;;  %v6949_v55 = vld [vmem:[%s6486_s7 + $0x80] sm:$0x1] }
  0x90   : > { %v5159_v28 = vrot.slane %v5143_v6, 9  ;;  %5754 = vmatprep.mubr.msk.bf16.mxu0 %vm660_vm3, %v5174_v18  ;;  %v594_v60 = vrot.slane %v593_v21, 4  ;;  %v603_v20 = vor.u32 %v602_v25, %v598_v61  ;;  %v2830_v44 = vrot.slane %v5079_v11, 5  ;;  %v5085_v57 = vld [vmem:[%s6486_s7 + $0x88] sm:$0xf] }
  0x91   : > { %5600 = vmatprep.mubr.msk.bf16.mxu1 %vm660_vm3, %v4890_v23  ;;  %v2833_v34 = vrot.slane %v5080_v8, 5  ;;  %v2824_v45 = vsel %vm6738_vm7, %v5158_v10, %v2823_v38  ;;  %v2825_v59 = vrot.slane %v2823_v38, 4  ;;  %v4908_v62 = vcombine.low %v6250_v51, %v6942_v15  ;;  %v5086_v54 = vld [vmem:[%s6486_s7 + $0x8c] sm:$0x1]  ;;  %v5088_v17 = vld [vmem:[%s6486_s7 + $0x94] sm:$0xf] }
  0x92   : > { %v599_v9 = vsel %vm6512_vm4, %v594_v60, %v598_v61  ;;  %v604_v26 = vrot.slane %v603_v20, 4  ;;  %v2831_v48 = vsel %vm6738_vm7, %v5159_v28, %v2830_v44  ;;  %v2832_v49 = vrot.slane %v2830_v44, 4  ;;  %v5145_v61 = vld [vmem:[%s6486_s7 + $0x84] sm:$0xe]  ;;  %v5146_v23 = vld [vmem:[%s6486_s7 + $0x90] sm:$0xe] }
  0x93   : > { %v2827_v50 = vsel %vm6738_vm7, %v2825_v59, %v2826_v1  ;;  %v5160_v58 = vrot.slane %v5144_v47, 9  ;;  %v2837_v7 = vrot.slane %v6946_v40, 5  ;;  %v2840_v41 = vrot.slane %v6949_v55, 5  ;;  %v5089_v25 = vld [vmem:[%s6486_s7 + $0x98] sm:$0x1] }
  0x94   : > { %v609_v4 = vsel %vm6512_vm4, %v604_v26, %v608_v31  ;;  %v5175_v12 = vcombine.low %v2824_v45, %v2827_v50  ;;  %v2834_v63 = vsel %vm6738_vm7, %v2832_v49, %v2833_v34  ;;  %v5161_v10 = vrot.slane %v5145_v61, 9  ;;  %v5091_v31 = vld [vmem:[%s6486_s7 + $0xa0] sm:$0xf]  ;;  %v5092_v60 = vld [vmem:[%s6486_s7 + $0xa4] sm:$0x1] }
  0x95   : > { %v4891_v2 = vcombine.low %v599_v9, %v609_v4  ;;  %v5176_v6 = vcombine.low %v2831_v48, %v2834_v63  ;;  %v2844_v11 = vrot.slane %v5085_v57, 5  ;;  %v2847_v8 = vrot.slane %v5086_v54, 5  ;;  %v5147_v20 = vld [vmem:[%s6486_s7 + $0x9c] sm:$0xe]  ;;  %v6252_v44 = vld [vmem:[%s6486_s7 + $0xc] sm:$0xf] }
  0x96   : > { %5755 = vmatmul.mubr.msk.bf16.gmra.mrb[12].mxu0 %vm660_vm3, %v5175_v12  ;;  %v2838_v18 = vsel %vm6738_vm7, %v5160_v58, %v2837_v7  ;;  %v2839_v21 = vrot.slane %v2837_v7, 4  ;;  %v2851_v28 = vrot.slane %v5088_v17, 5  ;;  %v6976_v34 = vld [vmem:[%s6486_s7 + $0x10] sm:$0xf]  ;;  %v6254_v47 = vld [vmem:[%s6486_s7 + $0x18] sm:$0xf] }
  0x97   : > { %5601 = vmatmul.mubr.msk.bf16.gmra.mrb[28].mxu1 %vm660_vm3, %v4891_v2  ;;  %5758 = vmatprep.mubr.msk.bf16.mxu0 %vm660_vm3, %v5176_v6  ;;  %v2845_v38 = vsel %vm6738_vm7, %v5161_v10, %v2844_v11  ;;  %v2846_v1 = vrot.slane %v2844_v11, 4  ;;  %v4909_v45 = vcombine.low %v6252_v44, %v6976_v34  ;;  %v6983_v9 = vld [vmem:[%s6486_s7 + $0x1c] sm:$0xf]  ;;  %v5162_v48 = vrot.slane %v5146_v23, 9  ;;  %v5094_v57 = vld [vmem:[%s6486_s7 + $0xac] sm:$0xf] }
  0x98   : > { %5606 = vmatprep.mubr.msk.bf16.mxu1 %vm660_vm3, %v4908_v62  ;;  %v2841_v59 = vsel %vm6738_vm7, %v2839_v21, %v2840_v41  ;;  %v4910_v26 = vcombine.low %v6254_v47, %v6983_v9  ;;  %v2853_v51 = vrot.slane %v2851_v28, 4  ;;  %v2854_v62 = vrot.slane %v5089_v25, 5  ;;  %v6256_v54 = vld [vmem:[%s8257_s1 + $0x4] sm:$0x3]  ;;  %v5097_v2 = vld [vmem:[%s6486_s7 + $0xb8] sm:$0xf] }
  0x99   : > { %v5177_v49 = vcombine.low %v2838_v18, %v2841_v59  ;;  %v2848_v50 = vsel %vm6738_vm7, %v2846_v1, %v2847_v8  ;;  %v5163_v12 = vrot.slane %v5147_v20, 9  ;;  %v2858_v63 = vrot.slane %v5091_v31, 5  ;;  %v6998_v7 = vld [vmem:[%s8257_s1 + $0x6] sm:$0x3]  ;;  %v5095_v10 = vld [vmem:[%s6486_s7 + $0xb0] sm:$0x1] }
  0x9a   : > { %v5178_v4 = vcombine.low %v2845_v38, %v2848_v50  ;;  %v2861_v58 = vrot.slane %v5092_v60, 5  ;;  %v1428_v61 = vsel %vm709_vm0, %v6256_v54, 0  ;;  %v2852_v41 = vsel %vm6738_vm7, %v5162_v48, %v2851_v28  ;;  %v5148_v11 = vld [vmem:[%s6486_s7 + $0xa8] sm:$0xe]  ;;  %v5098_v25 = vld [vmem:[%s6486_s7 + $0xbc] sm:$0x1] }
  0x9b   : > { %v2860_v6 = vrot.slane %v2858_v63, 4  ;;  %v2855_v17 = vsel %vm6738_vm7, %v2853_v51, %v2854_v62  ;;  %v2865_v8 = vrot.slane %v5094_v57, 5  ;;  %v2859_v23 = vsel %vm6738_vm7, %v5163_v12, %v2858_v63  ;;  %v5149_v31 = vld [vmem:[%s6486_s7 + $0xb4] sm:$0xe]  ;;  %v6257_v38 = vld [vmem:[%s6486_s7 + $0x24] sm:$0xf] }
  0x9c   : > { %v2872_v21 = vrot.slane %v5097_v2, 5  ;;  %v7019_v1 = vld [vmem:[%s6486_s7 + $0x28] sm:$0xf]  ;;  %v5179_v60 = vcombine.low %v2852_v41, %v2855_v17  ;;  %v5164_v44 = vrot.slane %v5148_v11, 9  ;;  %v2868_v59 = vrot.slane %v5095_v10, 5 }
  0x9d   : > { %v2862_v18 = vsel %vm6738_vm7, %v2860_v6, %v2861_v58  ;;  %v4911_v28 = vcombine.low %v6257_v38, %v7019_v1  ;;  %v6259_v47 = vld [vmem:[%s6486_s7 + $0x30] sm:$0xf]  ;;  %v2875_v51 = vrot.slane %v5098_v25, 5  ;;  %v5100_v62 = vld [vmem:[%s6486_s7 + $0xc4] sm:$0xf]  ;;  %v2260_v25 = vshrl.u32 %v6946_v40, 16 }
  0x9e   : > { %5759 = vmatmul.mubr.msk.bf16.gmra.mrb[16].mxu0 %vm660_vm3, %v5177_v49  ;;  %v5180_v20 = vcombine.low %v2859_v23, %v2862_v18  ;;  %v5165_v49 = vrot.slane %v5149_v31, 9  ;;  %v2874_v50 = vrot.slane %v2872_v21, 4  ;;  %v2866_v57 = vsel %vm6738_vm7, %v5164_v44, %v2865_v8  ;;  %v5150_v12 = vld [vmem:[%s6486_s7 + $0xc0] sm:$0xe]  ;;  %v6261_v41 = vld [vmem:[%s6486_s7 + $0x3c] sm:$0xf] }
  0x9f   : > { %5607 = vmatmul.mubr.msk.bf16.vlgmr.msra.gmra.mrb[0].mxu1 %vm660_vm3, %v4909_v45  ;;  %5762 = vmatprep.mubr.msk.bf16.mxu0 %vm660_vm3, %v5178_v4  ;;  %v2867_v45 = vrot.slane %v2865_v8, 4  ;;  %v2879_v63 = vrot.slane %v5100_v62, 5  ;;  %v5166_v6 = vrot.slane %v5150_v12, 9  ;;  %v7044_v17 = vld [vmem:[%s6486_s7 + $0x40] sm:$0xf]  ;;  %v4914_v18 = vcombine.low %v6651_v27, %v6654_v36  ;;  %v6213_v62 = vld [vmem:[%s6486_s7 + $0x24] sm:$0xff]  }
  0xa0   : > { %5639 = vmatpush3.bf16.msra.mxu1 %v1428_v61  ;;  %5610 = vmatprep.mubr.msk.bf16.mxu1 %vm660_vm3, %v4910_v26  ;;  %v7024_v26 = vld [vmem:[%s6486_s7 + $0x34] sm:$0xf]  ;;  %v2873_v58 = vsel %vm6738_vm7, %v5165_v49, %v2872_v21  ;;  %v2876_v54 = vsel %vm6738_vm7, %v2874_v50, %v2875_v51  ;;  %v5101_v61 = vld [vmem:[%s6486_s7 + $0xc8] sm:$0x1]  ;;  %v4913_v10 = vcombine.low %v6261_v41, %v7044_v17  ;;  %v2256_v21 = vshll.u32 %v6946_v40, 16 }
  0xa1   : > { %6137 = vmatprep.subr.msk.bf16.mxu1 %vm709_vm0, %v6998_v7  ;;  %v4912_v48 = vcombine.low %v6259_v47, %v7024_v26  ;;  %v2869_v4 = vsel %vm6738_vm7, %v2867_v45, %v2868_v59  ;;  %v5182_v11 = vcombine.low %v2873_v58, %v2876_v54  ;;  %v2881_v8 = vrot.slane %v2879_v63, 4  ;;  %v1166_v45 = vld [vmem:[%s6486_s7] sm:$0xe]  ;;  %v1167_v59 = vld [vmem:[%s6486_s7 + $0xc] sm:$0xe] }
  0xa2   : > { %v5181_v2 = vcombine.low %v2866_v57, %v2869_v4  ;;  %v2882_v23 = vrot.slane %v5101_v61, 5  ;;  %v2880_v31 = vsel %vm6738_vm7, %v5166_v6, %v2879_v63  ;;  %v7059_v27 = vrot.slane %v2256_v21, 5  ;;  %v1170_v41 = vld [vmem:[%s6486_s7 + $0x30] sm:$0xe] }
  0xa3   : > { %v2262_v36 = vrot.slane %v2260_v25, 4  ;;  %v4916_v44 = vcombine.low %v6711_v19, %v6717_v35  ;;  %v2266_v47 = vshll.u32 %v6949_v55, 16  ;;  %v4940_v19 = vrot.slane %v1166_v45, 9 }
  0xa4   : > { %v2883_v38 = vsel %vm6738_vm7, %v2881_v8, %v2882_v23  ;;  %8279 = vst [vmem:[#allocation6_spill] sm:$0xff] %v7059_v27  ;;  %v4941_v35 = vrot.slane %v1167_v59, 9  ;;  %v1233_v4 = vrot.slane %v6983_v9, 5  ;;  %v1240_v12 = vrot.slane %v7019_v1, 5  ;;  %v1171_v8 = vld [vmem:[%s6486_s7 + $0x3c] sm:$0xe] }
  0xa5   : > { %v5183_v40 = vcombine.low %v2880_v31, %v2883_v38  ;;  %v2263_v49 = vor.u32 %v2262_v36, %v7059_v27  ;;  %v7079_v51 = vrot.slane %v2266_v47, 5  ;;  %v4917_v58 = vcombine.low %v6732_v0, %v6745_v29  ;;  %v1172_v31 = vld [vmem:[%s6486_s7 + $0x48] sm:$0xe]  ;;  %v6267_v59 = vld [vmem:[%s6486_s7 + $0x38] sm:$0x1] }
  0xa6   : > { %5763 = vmatmul.mubr.msk.bf16.gmra.mrb[20].mxu0 %vm660_vm3, %v5179_v60  ;;  %v4915_v60 = vcombine.low %v6680_v24, %v6686_v37  ;;  %v6264_v24 = vld [vmem:[%s6486_s7 + $0x14] sm:$0x1]  ;;  %v4068_v54 = vsel %vm709_vm0, %v6803_v22, 0  ;;  %v4918_v61 = vcombine.low %v6764_v53, %v6771_v16  ;;  %v4919_v6 = vcombine.low %v6790_v39, %v6798_v43  ;;  %v6265_v16 = vld [vmem:[%s6486_s7 + $0x20] sm:$0x1] }
  0xa7   : > { %5611 = vmatmul.mubr.msk.bf16.gmra.mrb[4].mxu1 %vm660_vm3, %v4911_v28  ;;  %5766 = vmatprep.mubr.msk.bf16.mxu0 %vm660_vm3, %v5180_v20  ;;  %v1226_v28 = vrot.slane %v6976_v34, 5  ;;  %v6211_v20 = vld [vmem:[%s6486_s7 + $0x18] sm:$0xff]   ;;  %v6263_v34 = vld [vmem:[%s6486_s7 + $0x8] sm:$0x1]  ;;  %v1229_v37 = vrot.slane %v6264_v24, 5  ;;  %8280 = vst [vmem:[#allocation7_spill] sm:$0xff] %v7079_v51  ;;  %v4920_v9 = vcombine.low %v6822_v5, %v6834_v30 }
  0xa8   : > { %5614 = vmatprep.mubr.msk.bf16.mxu1 %vm660_vm3, %v4912_v48  ;;  %v1219_v48 = vrot.slane %v6942_v15, 5  ;;  %v1222_v50 = vrot.slane %v6263_v34, 5  ;;  %v1168_v15 = vld [vmem:[%s6486_s7 + $0x18] sm:$0xe]  ;;  %v7084_v63 = vrot.slane %v2263_v49, 4  ;;  %v1236_v22 = vrot.slane %v6265_v16, 5 }
  0xa9   : > { %v1228_v55 = vrot.slane %v1226_v28, 4  ;;  %v4942_v1 = vrot.slane %v1168_v15, 9  ;;  %v7106_v29 = vsel %vm6738_vm7, %v4941_v35, %v1226_v28  ;;  %v1242_v25 = vrot.slane %v1240_v12, 4  ;;  %v5265_v24 = vld [vmem:[%s6486_s7 + $0x18] sm:$0xf] }
  0xaa   : > { %v1221_v57 = vrot.slane %v1219_v48, 4  ;;  %8281 = vst [vmem:[#allocation8_spill] sm:$0xff] %v7084_v63  ;;  %v7102_v0 = vsel %vm6738_vm7, %v4940_v19, %v1219_v48  ;;  %v1250_v47 = vrot.slane %v6267_v59, 5  ;;  %v7143_v49 = vsel %vm709_vm0, %v6998_v7, 0  ;;  %v5266_v7 = vld [vmem:[%s6486_s7 + $0x1c] sm:$0xf] }
  0xab   : > { %v7110_v53 = vsel %vm6738_vm7, %v1228_v55, %v1229_v37  ;;  %v7147_v34 = vsel %vm6738_vm7, %v4942_v1, %v1233_v4  ;;  %v6217_v37 = vld [vmem:[%s6486_s7 + $0x3c] sm:$0xff]   ;;  %v4945_v35 = vrot.slane %v1171_v8, 9  ;;  %v6268_v55 = vld [vmem:[%s6486_s7 + $0x44] sm:$0x1]  ;;  %v3589_v8 = vshll.u32 %v5265_v24, 16 }
  0xac   : > { %v7121_v23 = vsel %vm6738_vm7, %v1221_v57, %v1222_v50  ;;  %v1173_v50 = vld [vmem:[%s6486_s7 + $0x54] sm:$0xe]  ;;  %v1257_v15 = vrot.slane %v6268_v55, 5  ;;  %v5269_v39 = vld [vmem:[%s6486_s7 + $0x28] sm:$0xf] }
  0xad   : > { %v6275_v5 = vld [vmem:[%s6486_s7 + $0x70] sm:$0xf] }
  0xae   : > { %5767 = vmatmul.mubr.msk.bf16.gmra.mrb[24].mxu0 %vm660_vm3, %v5181_v2  ;;  %v1169_v2 = vld [vmem:[%s6486_s7 + $0x24] sm:$0xe]  ;;  %v1282_v30 = vrot.slane %v6275_v5, 5 }
  0xaf   : > { %5615 = vmatmul.mubr.msk.bf16.gmra.mrb[8].mxu1 %vm660_vm3, %v4913_v10  ;;  %5770 = vmatprep.mubr.msk.bf16.mxu0 %vm660_vm3, %v5182_v11  ;;  %v1247_v10 = vrot.slane %v7024_v26, 5  ;;  %v6215_v11 = vld [vmem:[%s6486_s7 + $0x30] sm:$0xff]   ;;  %v4943_v21 = vrot.slane %v1169_v2, 9 }
  0xb0   : > { %5618 = vmatprep.mubr.msk.bf16.mxu1 %vm660_vm3, %v4914_v18  ;;  %v7117_v26 = vld [vmem:[%s8257_s1 + $0x10] sm:$0x3]  ;;  %v1235_v18 = vrot.slane %v1233_v4, 4  ;;  %v1284_v48 = vrot.slane %v1282_v30, 4 }
  0xb1   : > { %v1249_v45 = vrot.slane %v1247_v10, 4  ;;  %v7154_v19 = vsel %vm6738_vm7, %v4943_v21, %v1240_v12  ;;  %v3599_v21 = vshrl.u32 %v5266_v7, 16 }
  0xb2   : > { %v7163_v4 = vsel %vm6738_vm7, %v1235_v18, %v1236_v22  ;;  %v3586_v22 = vshrl.u32 %v5265_v24, 16  ;;  %v3595_v18 = vshll.u32 %v5266_v7, 16  ;;  %v5268_v24 = vld [vmem:[%s6486_s7 + $0x24] sm:$0xf] }
  0xb3   : > { %v7176_v1 = vsel %vm6738_vm7, %v1249_v45, %v1250_v47 }
  0xb4   : > { %v3588_v43 = vrot.slane %v3586_v22, 4  ;;  %v7218_v7 = vrot.slane %v3595_v18, 5  ;;  %v3613_v22 = vshll.u32 %v5268_v24, 16  ;;  %v3623_v18 = vshrl.u32 %v5269_v39, 16 }
  0xb6   : > { %5771 = vmatmul.mubr.msk.bf16.gmra.mrb[28].mxu0 %vm660_vm3, %v5183_v40  ;;  %v6266_v40 = vld [vmem:[%s6486_s7 + $0x2c] sm:$0x1]  ;;  %v3615_v27 = vrot.slane %v3613_v22, 5 }
  0xb7   : > { %5619 = vmatmul.mubr.msk.bf16.gmra.mrb[12].mxu1 %vm660_vm3, %v4915_v60  ;;  %5776 = vmatprep.mubr.msk.bf16.mxu0 %vm660_vm3, %v6211_v20  ;;  %v1243_v28 = vrot.slane %v6266_v40, 5  ;;  %v1254_v60 = vrot.slane %v7044_v17, 5  ;;  %v6271_v40 = vld [vmem:[%s6486_s7 + $0x50] sm:$0x1]  ;;  %v6276_v17 = vld [vmem:[%s6486_s7 + $0x74] sm:$0x1] }
  0xb8   : > { %5622 = vmatprep.mubr.msk.bf16.mxu1 %vm660_vm3, %v4916_v44  ;;  %v4944_v44 = vrot.slane %v1170_v41, 9  ;;  %v4947_v41 = vrot.slane %v1173_v50, 9  ;;  %v1174_v50 = vld [vmem:[%s6486_s7 + $0x60] sm:$0xe]  ;;  %v5270_v20 = vld [vmem:[%s6486_s7 + $0x2c] sm:$0x1] }
  0xb9   : > { %v1256_v12 = vrot.slane %v1254_v60, 4  ;;  %v7189_v45 = vsel %vm6738_vm7, %v4945_v35, %v1254_v60  ;;  %v6272_v35 = vld [vmem:[%s6486_s7 + $0x5c] sm:$0x1] }
  0xba   : > { %v7172_v2 = vsel %vm6738_vm7, %v4944_v44, %v1247_v10  ;;  %v1271_v55 = vrot.slane %v6272_v35, 5  ;;  %v1175_v35 = vld [vmem:[%s6486_s7 + $0x6c] sm:$0xe] }
  0xbb   : > { %v7193_v59 = vsel %vm6738_vm7, %v1256_v12, %v1257_v15  ;;  %v6273_v15 = vld [vmem:[%s6486_s7 + $0x64] sm:$0xf]  ;;  %v3601_v12 = vrot.slane %v3599_v21, 4  ;;  %v4949_v5 = vrot.slane %v1175_v35, 9 }
  0xbc   : > { %v6223_v21 = vld [vmem:[%s6486_s7 + $0x60] sm:$0xff]  }
  0xbe   : > { %5777 = vmatmul.mubr.msk.bf16.vlgmr.msra.gmra.mrb[0].mxu0 %vm660_vm3, %v6213_v62  ;;  %v6269_v62 = vld [vmem:[%s6486_s7 + $0x4c] sm:$0xf] }
  0xbf   : > { %5623 = vmatmul.mubr.msk.bf16.gmra.mrb[16].mxu1 %vm660_vm3, %v4917_v58  ;;  %5809 = vmatpush3.bf16.msra.mxu0 %v4068_v54  ;;  %v1261_v57 = vrot.slane %v6269_v62, 5  ;;  %v7167_v58 = vsel %vm6738_vm7, %v1242_v25, %v1243_v28  ;;  %v4946_v54 = vrot.slane %v1172_v31, 9  ;;  %v1264_v28 = vrot.slane %v6271_v40, 5 }
  0xc0   : > { %5626 = vmatprep.mubr.msk.bf16.mxu1 %vm660_vm3, %v4918_v61  ;;  %5780 = vmatprep.mubr.msk.bf16.mxu0 %vm660_vm3, %v6215_v11  ;;  %v6219_v61 = vld [vmem:[%s6486_s7 + $0x48] sm:$0xff]   ;;  %v6270_v11 = vld [vmem:[%s6486_s7 + $0x58] sm:$0xf]  ;;  %v1275_v62 = vrot.slane %v6273_v15, 5  ;;  %v5272_v15 = vld [vmem:[%s6486_s7 + $0x34] sm:$0xf] }
  0xc1   : > { %6143 = vmatprep.subr.msk.bf16.mxu0 %vm709_vm0, %v7117_v26  ;;  %v1268_v16 = vrot.slane %v6270_v11, 5  ;;  %v1263_v31 = vrot.slane %v1261_v57, 4  ;;  %v7197_v47 = vsel %vm6738_vm7, %v4946_v54, %v1261_v57  ;;  %v5267_v57 = vld [vmem:[%s6486_s7 + $0x20] sm:$0x1]  ;;  %v5271_v54 = vld [vmem:[%s6486_s7 + $0x30] sm:$0xf] }
  0xc2   : > { %v4948_v11 = vrot.slane %v1174_v50, 9  ;;  %v3637_v50 = vshll.u32 %v5271_v54, 16  ;;  %v3605_v25 = vshll.u32 %v5267_v57, 16  ;;  %v3643_v36 = vshll.u32 %v5272_v15, 16 }
  0xc3   : > { %v7208_v60 = vsel %vm6738_vm7, %v4947_v41, %v1268_v16  ;;  %v7224_v41 = vsel %vm6738_vm7, %v1263_v31, %v1264_v28  ;;  %v1277_v31 = vrot.slane %v1275_v62, 4  ;;  %v3634_v28 = vshrl.u32 %v5271_v54, 16 }
  0xc4   : > { %v7266_v35 = vrot.slane %v3643_v36, 5 }
  0xc6   : > { %5781 = vmatmul.mubr.msk.bf16.gmra.mrb[4].mxu0 %vm660_vm3, %v6217_v37  ;;  %v1270_v37 = vrot.slane %v1268_v16, 4  ;;  %v6274_v16 = vld [vmem:[%s6486_s7 + $0x68] sm:$0x1] }
  0xc7   : > { %5627 = vmatmul.mubr.msk.bf16.gmra.mrb[20].mxu1 %vm660_vm3, %v4919_v6  ;;  %5784 = vmatprep.mubr.msk.bf16.mxu0 %vm660_vm3, %v6219_v61  ;;  %v3591_v6 = vrot.slane %v3589_v8, 5  ;;  %v6221_v61 = vld [vmem:[%s6486_s7 + $0x54] sm:$0xff]   ;;  %v1278_v40 = vrot.slane %v6274_v16, 5  ;;  %v3619_v8 = vshll.u32 %v5269_v39, 16  ;;  %v3602_v16 = vor.u32 %v3601_v12, %v7218_v7 }
  0xc8   : > { %5630 = vmatprep.mubr.msk.bf16.mxu1 %vm660_vm3, %v4920_v9  ;;  %v3610_v9 = vshrl.u32 %v5268_v24, 16  ;;  %v7233_v44 = vsel %vm6738_vm7, %v1270_v37, %v1271_v55  ;;  %v1285_v24 = vrot.slane %v6276_v17, 5  ;;  %v3647_v39 = vshrl.u32 %v5272_v15, 16 }
  0xc9   : > { %v3592_v10 = vor.u32 %v3591_v6, %v3588_v43  ;;  %v7239_v37 = vrot.slane %v3619_v8, 5  ;;  %v3625_v55 = vrot.slane %v3623_v18, 4  ;;  %v8282_v43 = vcombine.low %v6843_v52, %v6854_v46  ;;  %v6277_v8 = vld [vmem:[%s6486_s7 + $0x7c] sm:$0xf]  ;;  %v7275_v18 = vld [vmem:[%s6486_s7 + $0x38] sm:$0x1] }
  0xca   : > { %v3612_v38 = vrot.slane %v3610_v9, 4  ;;  %v7248_v17 = vsel %vm6738_vm7, %v4948_v11, %v1275_v62  ;;  %v7252_v57 = vsel %vm6738_vm7, %v1277_v31, %v1278_v40  ;;  %v3636_v6 = vrot.slane %v3634_v28, 4  ;;  %8284 = vst [vmem:[#allocation9_spill] sm:$0xff] %v7275_v18 }
  0xcb   : > { %v3639_v12 = vrot.slane %v3637_v50, 5  ;;  %v8283_v52 = vcombine.low %v6875_v33, %v6880_v56  ;;  %v3593_v46 = vrot.slane %v3592_v10, 4  ;;  %v3603_v54 = vrot.slane %v3602_v16, 4  ;;  %v6225_v33 = vld [vmem:[%s6486_s7 + $0x6c] sm:$0xff]   ;;  %v1177_v16 = vld [vmem:[%s6486_s7 + $0x84] sm:$0xe] }
  0xcc   : > { %v3629_v62 = vshll.u32 %v5270_v20, 16  ;;  %v7260_v11 = vsel %vm6738_vm7, %v4949_v5, %v1282_v30  ;;  %v7264_v40 = vsel %vm6738_vm7, %v1284_v48, %v1285_v24  ;;  %v3649_v9 = vrot.slane %v3647_v39, 4  ;;  %v6226_v48 = vld [vmem:[%s6486_s7 + $0x78] sm:$0xff]  }
  0xcd   : > { %v3616_v10 = vor.u32 %v3615_v27, %v3612_v38  ;;  %v3626_v20 = vor.u32 %v3625_v55, %v7239_v37  ;;  %v1289_v30 = vrot.slane %v6277_v8, 5  ;;  %v3640_v38 = vor.u32 %v3639_v12, %v3636_v6  ;;  %v5274_v5 = vld [vmem:[%s6486_s7 + $0x3c] sm:$0xf] }
  0xce   : > { %5785 = vmatmul.mubr.msk.bf16.gmra.mrb[8].mxu0 %vm660_vm3, %v6221_v61  ;;  %v3607_v61 = vrot.slane %v3605_v25, 5  ;;  %v1176_v25 = vld [vmem:[%s6486_s7 + $0x78] sm:$0xe]  ;;  %v7291_v50 = vrot.slane %v3629_v62, 5  ;;  %v3650_v39 = vor.u32 %v3649_v9, %v7266_v35  ;;  %v3653_v55 = vshll.u32 %v7275_v18, 16 }
  0xcf   : > { %5631 = vmatmul.mubr.msk.bf16.gmra.mrb[24].mxu1 %vm660_vm3, %v8282_v43  ;;  %5788 = vmatprep.mubr.msk.bf16.mxu0 %vm660_vm3, %v6223_v21  ;;  %v3598_v21 = vsel %vm6512_vm4, %v3593_v46, %v7218_v7  ;;  %v4950_v24 = vrot.slane %v1176_v25, 9  ;;  %v6278_v43 = vld [vmem:[%s6486_s7 + $0x88] sm:$0xf]  ;;  %v7299_v7 = vld [vmem:[%s6486_s7 + $0x40] sm:$0xf]  ;;  %v3617_v12 = vrot.slane %v3616_v10, 4  ;;  %v8286_v62 = vcombine.low %v6895_v14, %v6904_v42 }
  0xd0   : > { %5634 = vmatprep.mubr.msk.bf16.mxu1 %vm660_vm3, %v8283_v52  ;;  %v3608_v31 = vsel %vm6512_vm4, %v3603_v54, %v3607_v61  ;;  %v1296_v6 = vrot.slane %v6278_v43, 5  ;;  %8285 = vst [vmem:[#allocation10_spill] sm:$0xff] %v7299_v7  ;;  %v3627_v52 = vrot.slane %v3626_v20, 4  ;;  %v1291_v46 = vrot.slane %v1289_v30, 4  ;;  %v6279_v54 = vld [vmem:[%s6486_s7 + $0x80] sm:$0x1] }
  0xd1   : > { %v1292_v61 = vrot.slane %v6279_v54, 5  ;;  %v3641_v9 = vrot.slane %v3640_v38, 4  ;;  %v4951_v25 = vrot.slane %v1177_v16, 9  ;;  %v3658_v8 = vshrl.u32 %v5274_v5, 16  ;;  %v6227_v10 = vld [vmem:[%s6486_s7 + $0x84] sm:$0xff]  }
  0xd2   : > { %v3661_v43 = vshll.u32 %v5274_v5, 16  ;;  %v7313_v20 = vcombine.low %v3598_v21, %v3608_v31  ;;  %v7317_v14 = vsel %vm709_vm0, %v7117_v26, 0  ;;  %v3671_v38 = vshrl.u32 %v7299_v7, 16  ;;  %v6228_v21 = vld [vmem:[%s6486_s7 + $0x90] sm:$0xff]   ;;  %v6284_v18 = vld [vmem:[%s6486_s7 + $0xa0] sm:$0xf] }
  0xd3   : > { %v3651_v16 = vrot.slane %v3650_v39, 4  ;;  %v3655_v5 = vrot.slane %v3653_v55, 5  ;;  %v1298_v54 = vrot.slane %v1296_v6, 4  ;;  %v3622_v31 = vsel %vm6512_vm4, %v3617_v12, %v7239_v37 }
  0xd4   : > { %v3632_v26 = vsel %vm6512_vm4, %v3627_v52, %v7291_v50  ;;  %v7332_v39 = vsel %vm6738_vm7, %v4950_v24, %v1289_v30  ;;  %v7336_v55 = vsel %vm6738_vm7, %v1291_v46, %v1292_v61  ;;  %v3646_v37 = vsel %vm6512_vm4, %v3641_v9, %v7266_v35  ;;  %v5280_v30 = vld [vmem:[%s6486_s7 + $0x54] sm:$0xf]  ;;  %v7353_v24 = vld [vmem:[%s6486_s7 + $0x58] sm:$0xf]  ;;  %v7358_v61 = vld [vmem:[%s6486_s7 + $0x90] sm:$0xe] }
  0xd5   : > { %v7349_v12 = vsel %vm6738_vm7, %v4951_v25, %v1296_v6  ;;  %v3660_v50 = vrot.slane %v3658_v8, 4  ;;  %v3663_v52 = vrot.slane %v3661_v43, 5  ;;  %v3673_v46 = vrot.slane %v3671_v38, 4 }
  0xd6   : > { %5789 = vmatmul.mubr.msk.bf16.gmra.mrb[12].mxu0 %vm660_vm3, %v6225_v33  ;;  %v8287_v33 = vcombine.low %v7102_v0, %v7121_v23  ;;  %v6280_v0 = vld [vmem:[%s6486_s7 + $0x8c] sm:$0x1]  ;;  %v3656_v36 = vsel %vm6512_vm4, %v3651_v16, %v3655_v5  ;;  %v3706_v25 = vshrl.u32 %v5280_v30, 16  ;;  %v3709_v8 = vshll.u32 %v5280_v30, 16 }
  0xd7   : > { %5635 = vmatmul.mubr.msk.bf16.gmra.mrb[28].mxu1 %vm660_vm3, %v8286_v62  ;;  %5792 = vmatprep.mubr.msk.bf16.mxu0 %vm660_vm3, %v6226_v48  ;;  %v3667_v48 = vshll.u32 %v7299_v7, 16  ;;  %v1299_v23 = vrot.slane %v6280_v0, 5  ;;  %v5277_v62 = vld [vmem:[%s6486_s7 + $0x48] sm:$0xf]  ;;  %v7342_v0 = vld [vmem:[%s6486_s7 + $0x4c] sm:$0xf]  ;;  %v8289_v38 = vcombine.low %v7106_v29, %v7110_v53  ;;  %v7376_v16 = vcombine.low %v3622_v31, %v3632_v26 }
  0xd8   : > { %5640 = vmatprep.mubr.msk.bf16.mxu1 %vm660_vm3, %v8287_v33  ;;  %v7339_v33 = vld [vmem:[%s6486_s7 + $0x44] sm:$0x1]  ;;  %v3682_v27 = vshrl.u32 %v5277_v62, 16  ;;  %v3685_v15 = vshll.u32 %v5277_v62, 16  ;;  %v3691_v6 = vshll.u32 %v7342_v0, 16  ;;  %v3695_v9 = vshrl.u32 %v7342_v0, 16 }
  0xd9   : > { %8288 = vst [vmem:[#allocation11_spill] sm:$0xff] %v7339_v33  ;;  %v7355_v28 = vrot.slane %v3667_v48, 5  ;;  %v7364_v35 = vsel %vm6738_vm7, %v1298_v54, %v1299_v23  ;;  %v3715_v43 = vshll.u32 %v7353_v24, 16  ;;  %v3719_v48 = vshrl.u32 %v7353_v24, 16  ;;  %v5283_v31 = vld [vmem:[%s6486_s7 + $0x60] sm:$0xf] }
  0xda   : > { %v3677_v5 = vshll.u32 %v7339_v33, 16  ;;  %v4952_v54 = vrot.slane %v7358_v61, 9  ;;  %v8290_v23 = vcombine.low %v7147_v34, %v7163_v4  ;;  %v7387_v29 = vcombine.low %v3646_v37, %v3656_v36  ;;  %v6229_v26 = vld [vmem:[%s6486_s7 + $0x9c] sm:$0xff]   ;;  %v6230_v30 = vld [vmem:[%s6486_s7 + $0xa8] sm:$0xff]  }
  0xdb   : > { %v3664_v53 = vor.u32 %v3663_v52, %v3660_v50  ;;  %v3684_v62 = vrot.slane %v3682_v27, 4  ;;  %v7398_v34 = vrot.slane %v3691_v6, 5  ;;  %v3697_v4 = vrot.slane %v3695_v9, 4  ;;  %v6281_v36 = vld [vmem:[%s8257_s1 + $0x8] sm:$0x3] }
  0xdc   : > { %v3708_v27 = vrot.slane %v3706_v25, 4  ;;  %v3711_v37 = vrot.slane %v3709_v8, 5  ;;  %v7407_v50 = vrot.slane %v3715_v43, 5  ;;  %v3721_v52 = vrot.slane %v3719_v48, 4  ;;  %v6282_v6 = vld [vmem:[%s6486_s7 + $0x94] sm:$0xf] }
  0xdd   : > { %v7413_v9 = vld [vmem:[%s6486_s7 + $0x64] sm:$0xf]  ;;  %v3730_v61 = vshrl.u32 %v5283_v31, 16  ;;  %v7415_v22 = vrot.slane %v3664_v53, 4  ;;  %v1310_v25 = vrot.slane %v6284_v18, 5  ;;  %v3698_v43 = vor.u32 %v3697_v4, %v7398_v34 }
  0xde   : > { %5793 = vmatmul.mubr.msk.bf16.gmra.mrb[16].mxu0 %vm660_vm3, %v6227_v10  ;;  %8291 = vst [vmem:[#allocation12_spill] sm:$0xff] %v7413_v9  ;;  %v3733_v10 = vshll.u32 %v5283_v31, 16  ;;  %v3712_v31 = vor.u32 %v3711_v37, %v3708_v27  ;;  %v3722_v53 = vor.u32 %v3721_v52, %v7407_v50  ;;  %v8292_v18 = vcombine.low %v7154_v19, %v7167_v58  ;;  %v6231_v37 = vld [vmem:[%s6486_s7 + $0xb4] sm:$0xff]  }
  0xdf   : > { %5641 = vmatmul.mubr.msk.bf16.vlgmr.msra.gmra.mrb[0].mxu1 %vm660_vm3, %v8289_v38  ;;  %5796 = vmatprep.mubr.msk.bf16.mxu0 %vm660_vm3, %v6228_v21  ;;  %v3687_v21 = vrot.slane %v3685_v15, 5  ;;  %v7396_v38 = vld [vmem:[%s6486_s7 + $0x50] sm:$0x1]  ;;  %v7405_v15 = vld [vmem:[%s6486_s7 + $0x5c] sm:$0x1]  ;;  %v8293_v27 = vcombine.low %v7172_v2, %v7176_v1  ;;  %v1312_v52 = vrot.slane %v1310_v25, 4 }
  0xe0   : > { %5673 = vmatpush3.bf16.msra.mxu1 %v7143_v49  ;;  %5644 = vmatprep.mubr.msk.bf16.mxu1 %vm660_vm3, %v8290_v23  ;;  %v3674_v49 = vor.u32 %v3673_v46, %v7355_v28  ;;  %v7409_v46 = vrot.slane %v3677_v5, 5  ;;  %v1303_v23 = vrot.slane %v6282_v6, 5  ;;  %v3701_v48 = vshll.u32 %v7396_v38, 16  ;;  %v1179_v5 = vld [vmem:[%s6486_s7 + $0x9c] sm:$0xe] }
  0xe1   : > { %6139 = vmatprep.subr.msk.bf16.mxu1 %vm709_vm0, %v6281_v36  ;;  %v6283_v36 = vld [vmem:[%s6486_s7 + $0x98] sm:$0x1]  ;;  %v3688_v7 = vor.u32 %v3687_v21, %v3684_v62  ;;  %v3725_v6 = vshll.u32 %v7405_v15, 16  ;;  %v3743_v62 = vshrl.u32 %v7413_v9, 16  ;;  %v3735_v4 = vrot.slane %v3733_v10, 5 }
  0xe2   : > { %v1306_v33 = vrot.slane %v6283_v36, 5  ;;  %v3675_v8 = vrot.slane %v3674_v49, 4  ;;  %v3739_v36 = vshll.u32 %v7413_v9, 16  ;;  %v7434_v21 = vsel %vm6738_vm7, %v4952_v54, %v1303_v23  ;;  %v7445_v2 = vld [vmem:[%s6486_s7 + $0x68] sm:$0x1] }
  0xe3   : > { %v3732_v49 = vrot.slane %v3730_v61, 4  ;;  %v3689_v19 = vrot.slane %v3688_v7, 4  ;;  %v4953_v58 = vrot.slane %v1179_v5, 9  ;;  %v3699_v3 = vrot.slane %v3698_v43, 4  ;;  %8294 = vst [vmem:[#allocation13_spill] sm:$0xff] %v7445_v2  ;;  %v6232_v5 = vld [vmem:[%s6486_s7 + $0xc0] sm:$0xff]  }
  0xe4   : > { %v3703_v54 = vrot.slane %v3701_v48, 5  ;;  %v3727_v63 = vrot.slane %v3725_v6, 5  ;;  %v1317_v61 = vrot.slane %v6880_v56, 5  ;;  %v3713_v10 = vrot.slane %v3712_v31, 4  ;;  %v1181_v31 = vld [vmem:[%s6486_s7 + $0xb4] sm:$0xe] }
  0xe5   : > { %v3723_v51 = vrot.slane %v3722_v53, 4  ;;  %v7447_v1 = vrot.slane %v3739_v36, 5  ;;  %v3745_v7 = vrot.slane %v3743_v62, 4  ;;  %v3670_v43 = vsel %vm6512_vm4, %v7415_v22, %v7355_v28  ;;  %v6286_v62 = vld [vmem:[%s6486_s7 + $0xb0] sm:$0x1] }
  0xe6   : > { %5797 = vmatmul.mubr.msk.bf16.gmra.mrb[20].mxu0 %vm660_vm3, %v6229_v26  ;;  %v1305_v26 = vrot.slane %v1303_v23, 4  ;;  %v1180_v23 = vld [vmem:[%s6486_s7 + $0xa8] sm:$0xe]  ;;  %v3680_v48 = vsel %vm6512_vm4, %v3675_v8, %v7409_v46  ;;  %v3736_v6 = vor.u32 %v3735_v4, %v3732_v49  ;;  %v3694_v53 = vsel %vm6512_vm4, %v3689_v19, %v7398_v34  ;;  %v5286_v46 = vld [vmem:[%s6486_s7 + $0x6c] sm:$0xf] }
  0xe7   : > { %5645 = vmatmul.mubr.msk.bf16.gmra.mrb[4].mxu1 %vm660_vm3, %v8292_v18  ;;  %5800 = vmatprep.mubr.msk.bf16.mxu0 %vm660_vm3, %v6230_v30  ;;  %v6285_v18 = vld [vmem:[%s6486_s7 + $0xa4] sm:$0x1]  ;;  %v7467_v36 = vsel %vm6738_vm7, %v4953_v58, %v1310_v25  ;;  %v4954_v28 = vrot.slane %v1180_v23, 9  ;;  %v1319_v8 = vrot.slane %v1317_v61, 4  ;;  %v3749_v49 = vshll.u32 %v7445_v2, 16 }
  0xe8   : > { %5648 = vmatprep.mubr.msk.bf16.mxu1 %vm660_vm3, %v8293_v27  ;;  %v1313_v30 = vrot.slane %v6285_v18, 5  ;;  %v7459_v56 = vsel %vm6738_vm7, %v1305_v26, %v1306_v33  ;;  %v3704_v33 = vsel %vm6512_vm4, %v3699_v3, %v3703_v54  ;;  %v1320_v26 = vrot.slane %v6286_v62, 5  ;;  %v5289_v18 = vld [vmem:[%s6486_s7 + $0x78] sm:$0xf]  ;;  %v7522_v54 = vld [vmem:[%s6486_s7 + $0xbc] sm:$0x1] }
  0xe9   : > { %v3718_v34 = vsel %vm6512_vm4, %v3713_v10, %v7407_v50  ;;  %v3728_v25 = vsel %vm6512_vm4, %v3723_v51, %v3727_v63  ;;  %v3746_v4 = vor.u32 %v3745_v7, %v7447_v1  ;;  %v4955_v27 = vrot.slane %v1181_v31, 9  ;;  %v7496_v51 = vld [vmem:[%s6486_s7 + $0x70] sm:$0xf]  ;;  %v7526_v10 = vld [vmem:[%s6486_s7 + $0x7c] sm:$0xf] }
  0xea   : > { %v7471_v22 = vsel %vm6738_vm7, %v1312_v52, %v1313_v30  ;;  %v8296_v3 = vcombine.low %v7189_v45, %v7193_v59  ;;  %v7492_v19 = vrot.slane %v3736_v6, 4  ;;  %v1324_v50 = vrot.slane %v6904_v42, 5  ;;  %8297 = vst [vmem:[#allocation15_spill] sm:$0xff] %v7496_v51  ;;  %8299 = vst [vmem:[#allocation16_spill] sm:$0xff] %v7526_v10  ;;  %v5292_v7 = vld [vmem:[%s6486_s7 + $0x84] sm:$0xf] }
  0xeb   : > { %8295 = vst [vmem:[#allocation14_spill] sm:$0xff] %v7471_v22  ;;  %v3754_v63 = vshrl.u32 %v5286_v46, 16  ;;  %v8298_v45 = vcombine.low %v7197_v47, %v7224_v41  ;;  %v7504_v58 = vcombine.low %v3694_v53, %v3704_v33  ;;  %v7510_v42 = vsel %vm6738_vm7, %v4954_v28, %v1317_v61  ;;  %v6233_v61 = vld [vmem:[%s6486_s7 + $0xcc] sm:$0xff]   ;;  %v7538_v31 = vld [vmem:[%s6486_s7 + $0x88] sm:$0xf] }
  0xec   : > { %v7513_v30 = vcombine.low %v3718_v34, %v3728_v25  ;;  %v7517_v47 = vsel %vm6738_vm7, %v1319_v8, %v1320_v26  ;;  %v7519_v41 = vrot.slane %v3749_v49, 5  ;;  %v3763_v6 = vshll.u32 %v7496_v51, 16  ;;  %8300 = vst [vmem:[#allocation17_spill] sm:$0xff] %v7538_v31  ;;  %v5295_v62 = vld [vmem:[%s6486_s7 + $0x90] sm:$0xf] }
  0xed   : > { %v7544_v28 = vrot.slane %v1324_v50, 4  ;;  %v7546_v33 = vrot.slane %v3754_v63, 4  ;;  %v3767_v8 = vshrl.u32 %v7496_v51, 16  ;;  %v3778_v26 = vshrl.u32 %v5289_v18, 16  ;;  %v7553_v25 = vld [vmem:[%s6486_s7 + $0x94] sm:$0xf] }
  0xee   : > { %5801 = vmatmul.mubr.msk.bf16.gmra.mrb[24].mxu0 %vm660_vm3, %v6231_v37  ;;  %v7490_v37 = vcombine.low %v3670_v43, %v3680_v48  ;;  %v7534_v43 = vsel %vm6738_vm7, %v4955_v27, %v1324_v50  ;;  %v3757_v48 = vshll.u32 %v5286_v46, 16  ;;  %v3781_v49 = vshll.u32 %v5289_v18, 16  ;;  %8301 = vst [vmem:[#allocation18_spill] sm:$0xff] %v7553_v25  ;;  %v7591_v2 = vld [vmem:[%s6486_s7 + $0x8c] sm:$0x1] }
  0xef   : > { %5649 = vmatmul.mubr.msk.bf16.gmra.mrb[8].mxu1 %vm660_vm3, %v8296_v3  ;;  %5804 = vmatprep.mubr.msk.bf16.mxu0 %vm660_vm3, %v6232_v5  ;;  %v7530_v5 = vrot.slane %v3746_v4, 4  ;;  %v3787_v46 = vshll.u32 %v7526_v10, 16  ;;  %v3791_v34 = vshrl.u32 %v7526_v10, 16  ;;  %v3802_v4 = vshrl.u32 %v5292_v7, 16 }
  0xf0   : > { %5652 = vmatprep.mubr.msk.bf16.mxu1 %vm660_vm3, %v8298_v45  ;;  %v3805_v27 = vshll.u32 %v5292_v7, 16  ;;  %v3811_v3 = vshll.u32 %v7538_v31, 16  ;;  %v3815_v50 = vshrl.u32 %v7538_v31, 16  ;;  %v7563_v45 = vld [vmem:[%s6486_s7 + $0x74] sm:$0x1]  ;;  %v3759_v18 = vrot.slane %v3757_v48, 5 }
  0xf1   : > { %v3826_v52 = vshrl.u32 %v5295_v62, 16  ;;  %v3829_v53 = vshll.u32 %v5295_v62, 16  ;;  %v8302_v7 = vcombine.low %v7208_v60, %v7233_v44  ;;  %v3769_v59 = vrot.slane %v3767_v8, 4  ;;  %v5298_v48 = vld [vmem:[%s6486_s7 + $0x9c] sm:$0xf] }
  0xf2   : > { %v3835_v63 = vshll.u32 %v7553_v25, 16  ;;  %v3839_v23 = vshrl.u32 %v7553_v25, 16  ;;  %v8303_v62 = vcombine.low %v7248_v17, %v7252_v57  ;;  %v7581_v44 = vld [vmem:[%s6486_s7 + $0x80] sm:$0x1]  ;;  %v3780_v60 = vrot.slane %v3778_v26, 4 }
  0xf3   : > { %8304 = vst [vmem:[#allocation19_spill] sm:$0xff] %v7581_v44  ;;  %v3804_v31 = vrot.slane %v3802_v4, 4  ;;  %v3807_v8 = vrot.slane %v3805_v27, 5  ;;  %v7585_v10 = vrot.slane %v3811_v3, 5  ;;  %v3817_v51 = vrot.slane %v3815_v50, 4 }
  0xf4   : > { %v7588_v25 = vld [vmem:[%s6486_s7 + $0xa0] sm:$0xf]  ;;  %v3828_v17 = vrot.slane %v3826_v52, 4  ;;  %v3831_v57 = vrot.slane %v3829_v53, 5  ;;  %v3853_v9 = vshll.u32 %v5298_v48, 16  ;;  %v3760_v26 = vor.u32 %v3759_v18, %v7546_v33 }
  0xf5   : > { %v3797_v27 = vshll.u32 %v7581_v44, 16  ;;  %v7600_v3 = vld [vmem:[%s6486_s7 + $0x98] sm:$0x1]  ;;  %v3859_v50 = vshll.u32 %v7588_v25, 16  ;;  %v3863_v52 = vshrl.u32 %v7588_v25, 16  ;;  %v3808_v22 = vor.u32 %v3807_v8, %v3804_v31 }
  0xf6   : > { %5805 = vmatmul.mubr.msk.bf16.gmra.mrb[28].mxu0 %vm660_vm3, %v6233_v61  ;;  %v7571_v61 = vrot.slane %v3763_v6, 5  ;;  %v3793_v6 = vrot.slane %v3791_v34, 4  ;;  %v3841_v34 = vrot.slane %v3839_v23, 4  ;;  %v3821_v33 = vshll.u32 %v7591_v2, 16 }
  0xf7   : > { %5653 = vmatmul.mubr.msk.bf16.gmra.mrb[12].mxu1 %vm660_vm3, %v8302_v7  ;;  %5810 = vmatprep.mubr.msk.bf16.mxu0 %vm660_vm3, %v7313_v20  ;;  %v3783_v7 = vrot.slane %v3781_v49, 5  ;;  %v7583_v20 = vrot.slane %v3787_v46, 5  ;;  %v3773_v49 = vshll.u32 %v7563_v45, 16  ;;  %v7595_v46 = vrot.slane %v3835_v63, 5 }
  0xf8   : > { %5656 = vmatprep.mubr.msk.bf16.mxu1 %vm660_vm3, %v8303_v62  ;;  %v3850_v62 = vshrl.u32 %v5298_v48, 16  ;;  %v3770_v4 = vor.u32 %v3769_v59, %v7571_v61  ;;  %v3818_v23 = vor.u32 %v3817_v51, %v7585_v10  ;;  %v3832_v59 = vor.u32 %v3831_v57, %v3828_v17  ;;  %v7633_v57 = vld [vmem:[%s6486_s7 + $0xa4] sm:$0x1] }
  0xf9   : > { %v3784_v53 = vor.u32 %v3783_v7, %v3780_v60  ;;  %v3794_v48 = vor.u32 %v3793_v6, %v7583_v20  ;;  %v3855_v18 = vrot.slane %v3853_v9, 5  ;;  %v8305_v44 = vcombine.low %v7260_v11, %v7264_v40 }
  0xfa   : > { %v3852_v63 = vrot.slane %v3850_v62, 4  ;;  %v8306_v31 = vrot.slane %v7522_v54, 5  ;;  %v3775_v51 = vrot.slane %v3773_v49, 5  ;;  %v3842_v60 = vor.u32 %v3841_v34, %v7595_v46  ;;  %v7636_v34 = vld [vmem:[%s6486_s7 + $0xac] sm:$0xf] }
  0xfb   : > { %v3845_v9 = vshll.u32 %v7600_v3, 16  ;;  %v8307_v11 = vcombine.low %v7332_v39, %v7336_v55  ;;  %v3761_v40 = vrot.slane %v3760_v26, 4  ;;  %v7629_v54 = vrot.slane %v3859_v50, 5 }
  0xfc   : > { %v3785_v7 = vrot.slane %v3784_v53, 4  ;;  %v3795_v6 = vrot.slane %v3794_v48, 4  ;;  %v3799_v8 = vrot.slane %v3797_v27, 5  ;;  %v3823_v17 = vrot.slane %v3821_v33, 5  ;;  %v7646_v48 = vld [vmem:[%s6486_s7 + $0xb0] sm:$0x1] }
  0xfd   : > { %v3809_v39 = vrot.slane %v3808_v22, 4  ;;  %v3819_v55 = vrot.slane %v3818_v23, 4  ;;  %v3833_v62 = vrot.slane %v3832_v59, 4  ;;  %v3856_v49 = vor.u32 %v3855_v18, %v3852_v63 }
  0xfe   : > { %5811 = vmatmul.mubr.msk.bf16.vlgmr.msra.gmra.mrb[0].mxu0 %vm660_vm3, %v7376_v16  ;;  %v7619_v16 = vsel %vm6738_vm7, %v7544_v28, %v8306_v31  ;;  %v3865_v28 = vrot.slane %v3863_v52, 4  ;;  %v3847_v26 = vrot.slane %v3845_v9, 5  ;;  %v3766_v52 = vsel %vm6512_vm4, %v3761_v40, %v7571_v61 }
  0xff   : > { %5657 = vmatmul.mubr.msk.bf16.gmra.mrb[16].mxu1 %vm660_vm3, %v8305_v44  ;;  %5843 = vmatpush3.bf16.msra.mxu0 %v7317_v14  ;;  %v3771_v14 = vrot.slane %v3770_v4, 4  ;;  %v5301_v44 = vld [vmem:[%s6486_s7 + $0xa8] sm:$0xf]  ;;  %v3869_v22 = vshll.u32 %v7633_v57, 16  ;;  %v3790_v33 = vsel %vm6512_vm4, %v3785_v7, %v7583_v20  ;;  %v3800_v23 = vsel %vm6512_vm4, %v3795_v6, %v3799_v8 }
 0x100   : > { %5660 = vmatprep.mubr.msk.bf16.mxu1 %vm660_vm3, %v8307_v11  ;;  %5814 = vmatprep.mubr.msk.bf16.mxu0 %vm660_vm3, %v7387_v29  ;;  %v3843_v29 = vrot.slane %v3842_v60, 4  ;;  %v3874_v4 = vshrl.u32 %v5301_v44, 16  ;;  %v3877_v50 = vshll.u32 %v5301_v44, 16  ;;  %v3866_v53 = vor.u32 %v3865_v28, %v7629_v54  ;;  %v5350_v11 = vld [vmem:[%s6486_s7 + $0x48] sm:$0xe] }
 0x101   : > { %v3776_v27 = vsel %vm6512_vm4, %v3771_v14, %v3775_v51  ;;  %v3883_v59 = vshll.u32 %v7636_v34, 16  ;;  %v3887_v61 = vshrl.u32 %v7636_v34, 16  ;;  %v3814_v63 = vsel %vm6512_vm4, %v3809_v39, %v7585_v10  ;;  %v7711_v39 = vld [vmem:[%s6486_s7 + $0xb8] sm:$0xf] }
 0x102   : > { %v3824_v18 = vsel %vm6512_vm4, %v3819_v55, %v3823_v17  ;;  %v3838_v20 = vsel %vm6512_vm4, %v3833_v62, %v7595_v46  ;;  %v3857_v31 = vrot.slane %v3856_v49, 4  ;;  %v8308_v51 = vcombine.low %v7349_v12, %v7364_v35 }
 0x103   : > { %v3876_v10 = vrot.slane %v3874_v4, 4  ;;  %v3879_v60 = vrot.slane %v3877_v50, 5  ;;  %v3893_v9 = vshll.u32 %v7646_v48, 16  ;;  %v8309_v46 = vcombine.low %v7434_v21, %v7459_v56  ;;  %v5304_v21 = vld [vmem:[%s6486_s7 + $0xb4] sm:$0xf] }
 0x104   : > { %v4971_v12 = vcombine.low %v7510_v42, %v7517_v47  ;;  %v8310_v35 = vsel %vm6512_vm4, %v7530_v5, %v7519_v41  ;;  %v3867_v14 = vrot.slane %v3866_v53, 4  ;;  %v3871_v28 = vrot.slane %v3869_v22, 5  ;;  %v5352_v4 = vld [vmem:[%s6486_s7 + $0x60] sm:$0xe]  ;;  %v5353_v53 = vld [vmem:[%s6486_s7 + $0x6c] sm:$0xe] }
 0x105   : > { %v4972_v56 = vcombine.low %v7534_v43, %v7619_v16  ;;  %v7694_v44 = vcombine.low %v3766_v52, %v3776_v27  ;;  %v7696_v42 = vrot.slane %v3883_v59, 5  ;;  %v3889_v47 = vrot.slane %v3887_v61, 4  ;;  %v8319_v16 = vld [vmem:[#allocation7_spill] sm:$0xff] }
 0x106   : > { %5815 = vmatmul.mubr.msk.bf16.gmra.mrb[4].mxu0 %vm660_vm3, %v7490_v37  ;;  %v3848_v37 = vsel %vm6512_vm4, %v3843_v29, %v3847_v26  ;;  %v7698_v41 = vcombine.low %v3790_v33, %v3800_v23  ;;  %v7700_v5 = vcombine.low %v3814_v63, %v3824_v18  ;;  %v3862_v6 = vsel %vm6512_vm4, %v3857_v31, %v7629_v54  ;;  %v8312_v23 = vld [vmem:[#allocation14_spill] sm:$0xff]  ;;  %v5307_v63 = vld [vmem:[%s6486_s7 + $0xc0] sm:$0xf]  ;;  %v8314_v18 = vld [vmem:[#allocation12_spill] sm:$0xff] }
 0x107   : > { %5661 = vmatmul.mubr.msk.bf16.gmra.mrb[20].mxu1 %vm660_vm3, %v8308_v51  ;;  %5818 = vmatprep.mubr.msk.bf16.mxu0 %vm660_vm3, %v7504_v58  ;;  %v8311_v58 = vsel %vm6512_vm4, %v7492_v19, %v7447_v1  ;;  %v7702_v7 = vcombine.low %v3838_v20, %v3848_v37  ;;  %v5366_v1 = vrot.slane %v5350_v11, 9  ;;  %v5351_v19 = vld [vmem:[%s6486_s7 + $0x54] sm:$0xe]  ;;  %v3880_v8 = vor.u32 %v3879_v60, %v3876_v10  ;;  %v8315_v31 = vld [vmem:[#allocation13_spill] sm:$0xff] }
 0x108   : > { %5664 = vmatprep.mubr.msk.bf16.mxu1 %vm660_vm3, %v8309_v46  ;;  %v5320_v40 = vcombine.low %v8311_v58, %v8310_v35  ;;  %v7708_v17 = vrot.slane %v3893_v9, 5  ;;  %v3898_v55 = vshrl.u32 %v5304_v21, 16  ;;  %v3872_v62 = vsel %vm6512_vm4, %v3867_v14, %v3871_v28  ;;  %v8316_v9 = vld [vmem:[#allocation15_spill] sm:$0xff]  ;;  %v7760_v35 = vld [vmem:[%s6486_s7 + $0xbc] sm:$0x1] }
 0x109   : > { %v3901_v49 = vshll.u32 %v5304_v21, 16  ;;  %v4357_v29 = vrot.slane %v7342_v0, 5  ;;  %v4360_v26 = vrot.slane %v7396_v38, 5  ;;  %v3890_v50 = vor.u32 %v3889_v47, %v7696_v42  ;;  %v7763_v58 = vld [vmem:[%s6486_s7 + $0xc4] sm:$0xf] }
 0x10a   : > { %v5367_v52 = vrot.slane %v5351_v19, 9  ;;  %v4364_v54 = vrot.slane %v7353_v24, 5  ;;  %v4367_v27 = vrot.slane %v7405_v15, 5  ;;  %v3907_v22 = vshll.u32 %v7711_v39, 16  ;;  %v5354_v19 = vld [vmem:[%s6486_s7 + $0x78] sm:$0xe] }
 0x10b   : > { %v3911_v33 = vshrl.u32 %v7711_v39, 16  ;;  %v7728_v0 = vsel %vm6738_vm7, %v5366_v1, %v4357_v29  ;;  %v4359_v38 = vrot.slane %v4357_v29, 4  ;;  %v8313_v59 = vcombine.low %v7467_v36, %v8312_v23  ;;  %v8317_v23 = vld [vmem:[#allocation16_spill] sm:$0xff] }
 0x10c   : > { %v7735_v24 = vcombine.low %v3862_v6, %v3872_v62  ;;  %v7739_v15 = vsel %vm6738_vm7, %v5367_v52, %v4364_v54  ;;  %v5368_v61 = vrot.slane %v5352_v4, 9  ;;  %v4371_v20 = vrot.slane %v8314_v18, 5  ;;  %v6234_v6 = vld [vmem:[%s6486_s7 + $0xc] sm:$0xff]  }
 0x10d   : > { %v7745_v36 = vsel %vm6738_vm7, %v4359_v38, %v4360_v26  ;;  %v4374_v51 = vrot.slane %v8315_v31, 5  ;;  %v5369_v37 = vrot.slane %v5353_v53, 9  ;;  %v4378_v11 = vrot.slane %v8316_v9, 5 }
 0x10e   : > { %5819 = vmatmul.mubr.msk.bf16.gmra.mrb[8].mxu0 %vm660_vm3, %v7513_v30  ;;  %v4366_v30 = vrot.slane %v4364_v54, 4  ;;  %v5383_v10 = vcombine.low %v7728_v0, %v7745_v36  ;;  %v4381_v46 = vrot.slane %v7563_v45, 5  ;;  %v7769_v14 = vsel %vm6738_vm7, %v5368_v61, %v4371_v20 }
 0x10f   : > { %5665 = vmatmul.mubr.msk.bf16.gmra.mrb[24].mxu1 %vm660_vm3, %v8313_v59  ;;  %5822 = vmatprep.mubr.msk.bf16.mxu0 %vm660_vm3, %v5320_v40  ;;  %v4373_v28 = vrot.slane %v4371_v20, 4  ;;  %v7771_v21 = vrot.slane %v3898_v55, 4  ;;  %v3922_v47 = vshrl.u32 %v5307_v63, 16  ;;  %v7775_v45 = vsel %vm6738_vm7, %v5369_v37, %v4378_v11  ;;  %v5081_v55 = vld [vmem:[%s6486_s7 + $0x78] sm:$0xf]  ;;  %v8318_v59 = vld [vmem:[#allocation19_spill] sm:$0xff] }
 0x110   : > { %5668 = vmatprep.mubr.msk.bf16.mxu1 %vm660_vm3, %v4971_v12  ;;  %v7753_v60 = vsel %vm6738_vm7, %v4366_v30, %v4367_v27  ;;  %v7757_v12 = vrot.slane %v3880_v8, 4  ;;  %v4380_v1 = vrot.slane %v4378_v11, 4  ;;  %v7779_v8 = vrot.slane %v3890_v50, 4 }
 0x111   : > { %v5384_v40 = vcombine.low %v7739_v15, %v7753_v60  ;;  %v7781_v62 = vrot.slane %v3901_v49, 5  ;;  %v3925_v29 = vshll.u32 %v5307_v63, 16  ;;  %v7785_v26 = vsel %vm6738_vm7, %v4373_v28, %v4374_v51  ;;  %v8321_v28 = vld [vmem:[#allocation17_spill] sm:$0xff] }
 0x112   : > { %v7788_v4 = vrot.slane %v3907_v22, 5  ;;  %v7790_v52 = vrot.slane %v3911_v33, 4  ;;  %v5385_v54 = vcombine.low %v7769_v14, %v7785_v26  ;;  %v7796_v27 = vsel %vm6738_vm7, %v4380_v1, %v4381_v46  ;;  %v5355_v33 = vld [vmem:[%s6486_s7 + $0x84] sm:$0xe]  ;;  %v6235_v1 = vld [vmem:[%s6486_s7 + $0x18] sm:$0xff]  }
 0x113   : > { %v3917_v49 = vshll.u32 %v7760_v35, 16  ;;  %v3931_v50 = vshll.u32 %v7763_v58, 16  ;;  %v5386_v53 = vcombine.low %v7775_v45, %v7796_v27  ;;  %v5370_v22 = vrot.slane %v5354_v19, 9  ;;  %v6297_v60 = vld [vmem:[%s6486_s7 + $0xa0] sm:$0xf] }
 0x114   : > { %v3924_v38 = vrot.slane %v3922_v47, 4  ;;  %v4388_v30 = vrot.slane %v8318_v59, 5  ;;  %v2247_v61 = vshrl.u32 %v5081_v55, 16  ;;  %v3927_v63 = vrot.slane %v3925_v29, 5  ;;  %v5310_v29 = vld [vmem:[%s6486_s7 + $0xcc] sm:$0xf] }
 0x115   : > { %v3935_v18 = vshrl.u32 %v7763_v58, 16  ;;  %v2250_v43 = vshll.u32 %v5081_v55, 16  ;;  %v5371_v37 = vrot.slane %v5355_v33, 9  ;;  %v3886_v9 = vsel %vm6512_vm4, %v7757_v12, %v7696_v42  ;;  %v7839_v55 = vld [vmem:[%s6486_s7 + $0xd0] sm:$0xf] }
 0x116   : > { %5823 = vmatmul.mubr.msk.bf16.gmra.mrb[12].mxu0 %vm660_vm3, %v7694_v44  ;;  %v4385_v44 = vrot.slane %v8317_v23, 5  ;;  %v2249_v51 = vrot.slane %v2247_v61, 4  ;;  %v3904_v11 = vor.u32 %v7781_v62, %v7771_v21  ;;  %v4392_v47 = vrot.slane %v8321_v28, 5  ;;  %v6236_v21 = vld [vmem:[%s6486_s7 + $0x24] sm:$0xff]   ;;  %v6301_v27 = vld [vmem:[%s6486_s7 + $0xac] sm:$0xf] }
 0x117   : > { %5669 = vmatmul.mubr.msk.bf16.gmra.mrb[28].mxu1 %vm660_vm3, %v4972_v56  ;;  %5826 = vmatprep.mubr.msk.bf16.mxu0 %vm660_vm3, %v7698_v41  ;;  %v8320_v56 = vld [vmem:[#allocation8_spill] sm:$0xff]  ;;  %v2252_v46 = vrot.slane %v2250_v43, 5  ;;  %v3896_v19 = vsel %vm6512_vm4, %v7779_v8, %v7708_v17  ;;  %v4395_v12 = vrot.slane %v7591_v2, 5  ;;  %v7847_v62 = vrot.slane %v3931_v50, 5  ;;  %v5356_v8 = vld [vmem:[%s6486_s7 + $0x90] sm:$0xe] }
 0x118   : > { %5674 = vmatprep.mubr.msk.bf16.mxu1 %vm660_vm3, %v6234_v6  ;;  %v2269_v41 = vsel %vm6512_vm4, %v8320_v56, %v8319_v16  ;;  %v7821_v20 = vsel %vm6738_vm7, %v5370_v22, %v4385_v44  ;;  %v4387_v31 = vrot.slane %v4385_v44, 4  ;;  %v3914_v6 = vor.u32 %v7790_v52, %v7788_v4  ;;  %v7853_v52 = vld [vmem:[%s6486_s7 + $0xc8] sm:$0x1]  ;;  %v8323_v16 = vld [vmem:[#allocation5_spill] sm:$0xff] }
 0x119   : > { %v3937_v22 = vrot.slane %v3935_v18, 4  ;;  %v2253_v17 = vor.u32 %v2252_v46, %v2249_v51  ;;  %v3919_v23 = vrot.slane %v3917_v49, 5  ;;  %v3928_v44 = vor.u32 %v3927_v63, %v3924_v38  ;;  %v8324_v51 = vld [vmem:[#allocation6_spill] sm:$0xff] }
 0x11a   : > { %v7843_v42 = vsel %vm6738_vm7, %v4387_v31, %v4388_v30  ;;  %v7857_v59 = vsel %vm6738_vm7, %v5371_v37, %v4392_v47  ;;  %v4394_v30 = vrot.slane %v4392_v47, 4  ;;  %v3946_v2 = vshrl.u32 %v5310_v29, 16 }
 0x11b   : > { %v5387_v33 = vcombine.low %v7821_v20, %v7843_v42  ;;  %v3949_v50 = vshll.u32 %v5310_v29, 16  ;;  %v3955_v61 = vshll.u32 %v7839_v55, 16  ;;  %v2254_v18 = vrot.slane %v2253_v17, 4  ;;  %v6237_v29 = vld [vmem:[%s6486_s7 + $0x30] sm:$0xff]  }
 0x11c   : > { %v3959_v49 = vshrl.u32 %v7839_v55, 16  ;;  %v7868_v38 = vsel %vm6738_vm7, %v4394_v30, %v4395_v12  ;;  %v5372_v63 = vrot.slane %v5356_v8, 9  ;;  %v3938_v56 = vor.u32 %v3937_v22, %v7847_v62 }
 0x11d   : > { %v3941_v31 = vshll.u32 %v7853_v52, 16  ;;  %v5388_v37 = vcombine.low %v7857_v59, %v7868_v38  ;;  %v5326_v46 = vcombine.low %v3886_v9, %v3896_v19  ;;  %v3905_v28 = vrot.slane %v3904_v11, 4  ;;  %v5357_v11 = vld [vmem:[%s6486_s7 + $0x9c] sm:$0xe] }
 0x11e   : > { %5827 = vmatmul.mubr.msk.bf16.gmra.mrb[16].mxu0 %vm660_vm3, %v7700_v5  ;;  %v8322_v5 = vld [vmem:[#allocation18_spill] sm:$0xff]  ;;  %v3915_v47 = vrot.slane %v3914_v6, 4  ;;  %v3929_v12 = vrot.slane %v3928_v44, 4  ;;  %v4402_v8 = vrot.slane %v7600_v3, 5  ;;  %v3948_v30 = vrot.slane %v3946_v2, 4  ;;  %v6238_v19 = vld [vmem:[%s6486_s7 + $0x3c] sm:$0xff]  }
 0x11f   : > { %5675 = vmatmul.mubr.msk.bf16.vlgmr.msra.gmra.mrb[0].mxu1 %vm660_vm3, %v6235_v1  ;;  %5830 = vmatprep.mubr.msk.bf16.mxu0 %vm660_vm3, %v7702_v7  ;;  %v4399_v43 = vrot.slane %v8322_v5, 5  ;;  %v2259_v7 = vsel %vm6512_vm4, %v2254_v18, %v8324_v51  ;;  %v3951_v18 = vrot.slane %v3949_v50, 5  ;;  %v7891_v5 = vrot.slane %v3955_v61, 5 }
 0x120   : > { %5877 = vmatpush3.bf16.msra.mxu1 %v8323_v16  ;;  %5678 = vmatprep.mubr.msk.bf16.mxu1 %vm660_vm3, %v6236_v21  ;;  %v7880_v1 = vcombine.low %v2259_v7, %v2269_v41  ;;  %v7884_v21 = vld [vmem:[%s6486_s7 + $0xd4] sm:$0x1]  ;;  %v3961_v9 = vrot.slane %v3959_v49, 4  ;;  %v3939_v41 = vrot.slane %v3938_v56, 4  ;;  %v3943_v6 = vrot.slane %v3941_v31, 5 }
 0x121   : > { %v7888_v22 = vsel %vm6738_vm7, %v5372_v63, %v4399_v43  ;;  %v4401_v17 = vrot.slane %v4399_v43, 4  ;;  %v3910_v63 = vsel %vm6512_vm4, %v3905_v28, %v7788_v4  ;;  %v3920_v2 = vsel %vm6512_vm4, %v3915_v47, %v3919_v23  ;;  %v6288_v16 = vld [vmem:[%s6486_s7 + $0x1c] sm:$0xf]  ;;  %v5358_v28 = vld [vmem:[%s6486_s7 + $0xa8] sm:$0xe] }
 0x122   : > { %v3965_v50 = vshll.u32 %v7884_v21, 16  ;;  %v5373_v61 = vrot.slane %v5357_v11, 9  ;;  %v4406_v49 = vrot.slane %v7588_v25, 5  ;;  %v3934_v4 = vsel %vm6512_vm4, %v3929_v12, %v7847_v62  ;;  %v5346_v62 = vld [vmem:[%s6486_s7 + $0x18] sm:$0xe]  ;;  %v6239_v47 = vld [vmem:[%s6486_s7 + $0x48] sm:$0xff]  }
 0x123   : > { %v7897_v44 = vsel %vm6738_vm7, %v4401_v17, %v4402_v8  ;;  %v3962_v43 = vor.u32 %v3961_v9, %v7891_v5  ;;  %v4409_v23 = vrot.slane %v7633_v57, 5  ;;  %v3944_v25 = vsel %vm6512_vm4, %v3939_v41, %v3943_v6  ;;  %v6289_v11 = vld [vmem:[%s6486_s7 + $0x20] sm:$0x1] }
 0x124   : > { %v5389_v3 = vcombine.low %v7888_v22, %v7897_v44  ;;  %v4329_v56 = vrot.slane %v6288_v16, 5  ;;  %v7923_v31 = vsel %vm6738_vm7, %v5373_v61, %v4406_v49  ;;  %v4408_v51 = vrot.slane %v4406_v49, 4  ;;  %v5359_v49 = vld [vmem:[%s6486_s7 + $0xb4] sm:$0xe] }
 0x125   : > { %v5327_v7 = vcombine.low %v3910_v63, %v3920_v2  ;;  %v3963_v17 = vrot.slane %v3962_v43, 4  ;;  %v5374_v41 = vrot.slane %v5358_v28, 9  ;;  %v4413_v6 = vrot.slane %v7636_v34, 5  ;;  %v5347_v2 = vld [vmem:[%s6486_s7 + $0x24] sm:$0xe] }
 0x126   : > { %5831 = vmatmul.mubr.msk.bf16.gmra.mrb[20].mxu0 %vm660_vm3, %v7735_v24  ;;  %v3952_v24 = vor.u32 %v3951_v18, %v3948_v30  ;;  %v7928_v57 = vsel %vm6738_vm7, %v4408_v51, %v4409_v23  ;;  %v6240_v30 = vld [vmem:[%s6486_s7 + $0x54] sm:$0xff]   ;;  %v5362_v18 = vrot.slane %v5346_v62, 9  ;;  %v4331_v9 = vrot.slane %v4329_v56, 4  ;;  %v6292_v28 = vld [vmem:[%s6486_s7 + $0x2c] sm:$0x1] }
 0x127   : > { %5679 = vmatmul.mubr.msk.bf16.gmra.mrb[4].mxu1 %vm660_vm3, %v6237_v29  ;;  %5834 = vmatprep.mubr.msk.bf16.mxu0 %vm660_vm3, %v5326_v46  ;;  %v3967_v46 = vrot.slane %v3965_v50, 5  ;;  %v5328_v29 = vcombine.low %v3934_v4, %v3944_v25  ;;  %v5390_v8 = vcombine.low %v7923_v31, %v7928_v57  ;;  %v4416_v63 = vrot.slane %v7646_v48, 5  ;;  %v6290_v50 = vld [vmem:[%s6486_s7 + $0x28] sm:$0xf]  ;;  %v5348_v25 = vld [vmem:[%s6486_s7 + $0x30] sm:$0xe] }
 0x128   : > { %5682 = vmatprep.mubr.msk.bf16.mxu1 %vm660_vm3, %v6238_v19  ;;  %v3953_v12 = vrot.slane %v3952_v24, 4  ;;  %v4332_v19 = vrot.slane %v6289_v11, 5  ;;  %v4336_v61 = vrot.slane %v6290_v50, 5  ;;  %v7951_v48 = vsel %vm6738_vm7, %v5374_v41, %v4413_v6  ;;  %v6242_v11 = vld [vmem:[%s6486_s7 + $0x6c] sm:$0xff]   ;;  %v8325_v41 = vld [vmem:[#allocation9_spill] sm:$0xff] }
 0x129   : > { %v3968_v34 = vsel %vm6512_vm4, %v3963_v17, %v3967_v46  ;;  %v4415_v24 = vrot.slane %v4413_v6, 4  ;;  %v4330_v43 = vsel %vm6738_vm7, %v5362_v18, %v4329_v56  ;;  %v5363_v51 = vrot.slane %v5347_v2, 9  ;;  %v5360_v50 = vld [vmem:[%s6486_s7 + $0xc0] sm:$0xe]  ;;  %v6306_v31 = vld [vmem:[%s6486_s7 + $0xc8] sm:$0x1] }
 0x12a   : > { %v3958_v4 = vsel %vm6512_vm4, %v3953_v12, %v7891_v5  ;;  %v4333_v23 = vsel %vm6738_vm7, %v4331_v9, %v4332_v19  ;;  %v6291_v5 = vld [vmem:[%s6486_s7 + $0x34] sm:$0xf]  ;;  %v6241_v12 = vld [vmem:[%s6486_s7 + $0x60] sm:$0xff]   ;;  %v5364_v18 = vrot.slane %v5348_v25, 9  ;;  %v4423_v9 = vrot.slane %v7760_v35, 5 }
 0x12b   : > { %v4343_v16 = vrot.slane %v6291_v5, 5  ;;  %v7962_v62 = vsel %vm6738_vm7, %v4415_v24, %v4416_v63  ;;  %v5329_v46 = vcombine.low %v3958_v4, %v3968_v34  ;;  %v5379_v17 = vcombine.low %v4330_v43, %v4333_v23  ;;  %v5349_v24 = vld [vmem:[%s6486_s7 + $0x3c] sm:$0xe] }
 0x12c   : > { %v5391_v56 = vcombine.low %v7951_v48, %v7962_v62  ;;  %v4346_v6 = vrot.slane %v8325_v41, 5  ;;  %v4337_v35 = vsel %vm6738_vm7, %v5363_v51, %v4336_v61  ;;  %v5376_v5 = vrot.slane %v5360_v50, 9 }
 0x12d   : > { %v4345_v19 = vrot.slane %v4343_v16, 4  ;;  %v4344_v23 = vsel %vm6738_vm7, %v5364_v18, %v4343_v16  ;;  %v4430_v51 = vrot.slane %v7853_v52, 5  ;;  %v2410_v57 = vshll.u32 %v6306_v31, 16 }
 0x12e   : > { %5835 = vmatmul.mubr.msk.bf16.gmra.mrb[24].mxu0 %vm660_vm3, %v5327_v7  ;;  %v5375_v7 = vrot.slane %v5359_v49, 9 }
 0x12f   : > { %5683 = vmatmul.mubr.msk.bf16.gmra.mrb[8].mxu1 %vm660_vm3, %v6239_v47  ;;  %5838 = vmatprep.mubr.msk.bf16.mxu0 %vm660_vm3, %v5328_v29  ;;  %v4339_v47 = vrot.slane %v6292_v28, 5  ;;  %v4420_v29 = vrot.slane %v7711_v39, 5  ;;  %v8326_v39 = vld [vmem:[#allocation10_spill] sm:$0xff]  ;;  %v4347_v25 = vsel %vm6738_vm7, %v4345_v19, %v4346_v6  ;;  %v5365_v28 = vrot.slane %v5349_v24, 9 }
 0x130   : > { %5686 = vmatprep.mubr.msk.bf16.mxu1 %vm660_vm3, %v6240_v30  ;;  %v4338_v30 = vrot.slane %v4336_v61, 4  ;;  %v4350_v49 = vrot.slane %v8326_v39, 5  ;;  %v4427_v61 = vrot.slane %v7763_v58, 5  ;;  %v6293_v39 = vld [vmem:[%s6486_s7 + $0x70] sm:$0xf]  ;;  %v4434_v24 = vrot.slane %v7839_v55, 5 }
 0x131   : > { %v7974_v63 = vsel %vm6738_vm7, %v5375_v7, %v4420_v29  ;;  %v4422_v2 = vrot.slane %v4420_v29, 4  ;;  %v5078_v7 = vld [vmem:[%s6486_s7 + $0x6c] sm:$0xf]  ;;  %v8327_v29 = vld [vmem:[#allocation11_spill] sm:$0xff] }
 0x132   : > { %v4340_v34 = vsel %vm6738_vm7, %v4338_v30, %v4339_v47  ;;  %v4352_v47 = vrot.slane %v4350_v49, 4  ;;  %v6243_v30 = vld [vmem:[%s6486_s7 + $0x78] sm:$0xff]   ;;  %v8005_v16 = vsel %vm6738_vm7, %v5376_v5, %v4427_v61  ;;  %v4429_v18 = vrot.slane %v4427_v61, 4 }
 0x133   : > { %v7981_v4 = vsel %vm6738_vm7, %v4422_v2, %v4423_v9  ;;  %v5381_v9 = vcombine.low %v4344_v23, %v4347_v25  ;;  %v2223_v19 = vshrl.u32 %v5078_v7, 16  ;;  %v2226_v41 = vshll.u32 %v5078_v7, 16 }
 0x134   : > { %v5392_v43 = vcombine.low %v7974_v63, %v7981_v4  ;;  %v8010_v58 = vsel %vm6738_vm7, %v4429_v18, %v4430_v51  ;;  %v4351_v6 = vsel %vm6738_vm7, %v5365_v28, %v4350_v49  ;;  %v4437_v49 = vrot.slane %v7884_v21, 5  ;;  %v6245_v51 = vld [vmem:[%s6486_s7 + $0x90] sm:$0xff]   ;;  %v6246_v21 = vld [vmem:[%s6486_s7 + $0x9c] sm:$0xff]  }
 0x135   : > { %v5393_v50 = vcombine.low %v8005_v16, %v8010_v58  ;;  %v2225_v23 = vrot.slane %v2223_v19, 4  ;;  %v2228_v25 = vrot.slane %v2226_v41, 5  ;;  %v4436_v7 = vrot.slane %v4434_v24, 4 }
 0x136   : > { %5839 = vmatmul.mubr.msk.bf16.gmra.mrb[28].mxu0 %vm660_vm3, %v5329_v46  ;;  %v5380_v46 = vcombine.low %v4337_v35, %v4340_v34  ;;  %v2232_v35 = vshll.u32 %v6293_v39, 16  ;;  %v2236_v34 = vshrl.u32 %v6293_v39, 16 }
 0x137   : > { %5687 = vmatmul.mubr.msk.bf16.gmra.mrb[12].mxu1 %vm660_vm3, %v6241_v12  ;;  %5844 = vmatprep.mubr.msk.bf16.mxu0 %vm660_vm3, %v5379_v17  ;;  %v4353_v12 = vrot.slane %v8327_v29, 5  ;;  %v5361_v17 = vld [vmem:[%s6486_s7 + $0xcc] sm:$0xe]  ;;  %v8032_v55 = vsel %vm6738_vm7, %v4436_v7, %v4437_v49 }
 0x138   : > { %5690 = vmatprep.mubr.msk.bf16.mxu1 %vm660_vm3, %v6242_v11  ;;  %v6244_v11 = vld [vmem:[%s6486_s7 + $0x84] sm:$0xff]   ;;  %v5377_v52 = vrot.slane %v5361_v17, 9  ;;  %v2238_v28 = vrot.slane %v2236_v34, 4  ;;  %v6294_v17 = vld [vmem:[%s6486_s7 + $0x74] sm:$0x1] }
 0x139   : > { %v4354_v2 = vsel %vm6738_vm7, %v4352_v47, %v4353_v12  ;;  %v5084_v47 = vld [vmem:[%s6486_s7 + $0x84] sm:$0xf]  ;;  %v2229_v12 = vor.u32 %v2228_v25, %v2225_v23  ;;  %v6248_v34 = vld [vmem:[%s6486_s7 + $0xb4] sm:$0xff]  }
 0x13a   : > { %v8027_v5 = vsel %vm6738_vm7, %v5377_v52, %v4434_v24  ;;  %v5382_v61 = vcombine.low %v4351_v6, %v4354_v2  ;;  %v2274_v18 = vshll.u32 %v5084_v47, 16  ;;  %v5087_v6 = vld [vmem:[%s6486_s7 + $0x90] sm:$0xf]  ;;  %v6247_v2 = vld [vmem:[%s6486_s7 + $0xa8] sm:$0xff]  }
 0x13b   : > { %v5394_v29 = vcombine.low %v8027_v5, %v8032_v55  ;;  %v2230_v52 = vrot.slane %v2229_v12, 4  ;;  %v2295_v23 = vshrl.u32 %v5087_v6, 16  ;;  %v2298_v25 = vshll.u32 %v5087_v6, 16 }
 0x13c   : > { %v2328_v12 = vshll.u32 %v6297_v60, 16 }
 0x13d   : > { %v2300_v14 = vrot.slane %v2298_v25, 5  ;;  %v6300_v25 = vld [vmem:[%s6486_s7 + $0xa4] sm:$0x1] }
 0x13e   : > { %5845 = vmatmul.mubr.msk.bf16.vlgmr.msra.gmra.mrb[0].mxu0 %vm660_vm3, %v5380_v46  ;;  %v2234_v46 = vrot.slane %v2232_v35, 5  ;;  %v5090_v35 = vld [vmem:[%s6486_s7 + $0x9c] sm:$0xf]  ;;  %v8074_v6 = vrot.slane %v2328_v12, 5 }
 0x13f   : > { %5691 = vmatmul.mubr.msk.bf16.gmra.mrb[16].mxu1 %vm660_vm3, %v6243_v30  ;;  %5848 = vmatprep.mubr.msk.bf16.mxu0 %vm660_vm3, %v5381_v9  ;;  %v2242_v30 = vshll.u32 %v6294_v17, 16  ;;  %v2271_v9 = vshrl.u32 %v5084_v47, 16  ;;  %v2322_v47 = vshll.u32 %v5090_v35, 16  ;;  %v6298_v17 = vld [vmem:[%s6486_s7 + $0x8c] sm:$0x1] }
 0x140   : > { %5694 = vmatprep.mubr.msk.bf16.mxu1 %vm660_vm3, %v6244_v11  ;;  %v2239_v13 = vor.u32 %v2238_v28, %v2234_v46  ;;  %v6295_v11 = vld [vmem:[%s6486_s7 + $0x88] sm:$0xf]  ;;  %v2235_v7 = vsel %vm6512_vm4, %v2230_v52, %v2234_v46 }
 0x141   : > { %v2280_v19 = vshll.u32 %v6295_v11, 16  ;;  %v2284_v41 = vshrl.u32 %v6295_v11, 16  ;;  %v2244_v0 = vrot.slane %v2242_v30, 5  ;;  %v2273_v36 = vrot.slane %v2271_v9, 4 }
 0x142   : > { %v2240_v39 = vrot.slane %v2239_v13, 4  ;;  %v2290_v30 = vshll.u32 %v6298_v17, 16  ;;  %v2297_v9 = vrot.slane %v2295_v23, 4  ;;  %v2324_v11 = vrot.slane %v2322_v47, 5 }
 0x143   : > { %v8051_v24 = vrot.slane %v2280_v19, 5  ;;  %v2286_v49 = vrot.slane %v2284_v41, 4  ;;  %v6249_v19 = vld [vmem:[%s6486_s7 + $0xc0] sm:$0xff]  }
 0x144   : > { %v2245_v46 = vsel %vm6512_vm4, %v2240_v39, %v2244_v0  ;;  %v5093_v39 = vld [vmem:[%s6486_s7 + $0xa8] sm:$0xf] }
 0x145   : > { %v2287_v13 = vor.u32 %v2286_v49, %v8051_v24  ;;  %v5111_v41 = vcombine.low %v2235_v7, %v2245_v46  ;;  %v2338_v7 = vshll.u32 %v6300_v25, 16  ;;  %v2346_v45 = vshll.u32 %v5093_v39, 16 }
 0x146   : > { %5849 = vmatmul.mubr.msk.bf16.gmra.mrb[4].mxu0 %vm660_vm3, %v5382_v61  ;;  %v6296_v61 = vld [vmem:[%s6486_s7 + $0x94] sm:$0xf] }
 0x147   : > { %5695 = vmatmul.mubr.msk.bf16.gmra.mrb[20].mxu1 %vm660_vm3, %v6245_v51  ;;  %5852 = vmatprep.mubr.msk.bf16.mxu0 %vm660_vm3, %v5383_v10  ;;  %v2276_v10 = vrot.slane %v2274_v18, 5  ;;  %v2304_v51 = vshll.u32 %v6296_v61, 16  ;;  %v2308_v28 = vshrl.u32 %v6296_v61, 16  ;;  %v2288_v0 = vrot.slane %v2287_v13, 4 }
 0x148   : > { %5698 = vmatprep.mubr.msk.bf16.mxu1 %vm660_vm3, %v6246_v21  ;;  %v2319_v21 = vshrl.u32 %v5090_v35, 16  ;;  %v6299_v35 = vld [vmem:[%s6486_s7 + $0x98] sm:$0x1]  ;;  %v2343_v61 = vshrl.u32 %v5093_v39, 16  ;;  %v5099_v39 = vld [vmem:[%s6486_s7 + $0xc0] sm:$0xf] }
 0x149   : > { %v2277_v15 = vor.u32 %v2276_v10, %v2273_v36  ;;  %v8071_v26 = vrot.slane %v2304_v51, 5  ;;  %v2292_v36 = vrot.slane %v2290_v30, 5  ;;  %v2301_v10 = vor.u32 %v2300_v14, %v2297_v9  ;;  %v5096_v51 = vld [vmem:[%s6486_s7 + $0xb4] sm:$0xf] }
 0x14a   : > { %v2321_v18 = vrot.slane %v2319_v21, 4  ;;  %v2356_v21 = vshrl.u32 %v6301_v27, 16  ;;  %v2367_v20 = vshrl.u32 %v5096_v51, 16  ;;  %v2370_v42 = vshll.u32 %v5096_v51, 16 }
 0x14b   : > { %v2278_v52 = vrot.slane %v2277_v15, 4  ;;  %v2293_v46 = vsel %vm6512_vm4, %v2288_v0, %v2292_v36  ;;  %v2302_v15 = vrot.slane %v2301_v10, 4  ;;  %v2340_v30 = vrot.slane %v2338_v7, 5 }
 0x14c   : > { %v2325_v23 = vor.u32 %v2324_v11, %v2321_v18  ;;  %v2345_v9 = vrot.slane %v2343_v61, 4  ;;  %v2358_v11 = vrot.slane %v2356_v21, 4  ;;  %v6305_v61 = vld [vmem:[%s6486_s7 + $0xbc] sm:$0x1] }
 0x14d   : > { %v2283_v47 = vsel %vm6512_vm4, %v2278_v52, %v8051_v24  ;;  %v2307_v0 = vsel %vm6512_vm4, %v2302_v15, %v8071_v26  ;;  %v2386_v22 = vshll.u32 %v6305_v61, 16 }
 0x14e   : > { %5853 = vmatmul.mubr.msk.bf16.gmra.mrb[8].mxu0 %vm660_vm3, %v5384_v40  ;;  %v2332_v40 = vshrl.u32 %v6297_v60, 16  ;;  %v2326_v17 = vrot.slane %v2325_v23, 4  ;;  %v5113_v24 = vcombine.low %v2283_v47, %v2293_v46 }
 0x14f   : > { %5699 = vmatmul.mubr.msk.bf16.gmra.mrb[24].mxu1 %vm660_vm3, %v6247_v2  ;;  %5856 = vmatprep.mubr.msk.bf16.mxu0 %vm660_vm3, %v5385_v54  ;;  %v2310_v54 = vrot.slane %v2308_v28, 4 }
 0x150   : > { %5702 = vmatprep.mubr.msk.bf16.mxu1 %vm660_vm3, %v6248_v34  ;;  %v2334_v2 = vrot.slane %v2332_v40, 4  ;;  %v2314_v34 = vshll.u32 %v6299_v35, 16  ;;  %v2331_v10 = vsel %vm6512_vm4, %v2326_v17, %v8074_v6  ;;  %v2412_v17 = vrot.slane %v2410_v57, 5 }
 0x151   : > { %v2311_v49 = vor.u32 %v2310_v54, %v8071_v26  ;;  %v2348_v54 = vrot.slane %v2346_v45, 5  ;;  %v6303_v26 = vld [vmem:[%s6486_s7 + $0xb0] sm:$0x1] }
 0x152   : > { %v2335_v28 = vor.u32 %v2334_v2, %v8074_v6  ;;  %v2316_v60 = vrot.slane %v2314_v34, 5  ;;  %v2362_v35 = vshll.u32 %v6303_v26, 16  ;;  %v2391_v34 = vshrl.u32 %v5099_v39, 16 }
 0x153   : > { %v2312_v13 = vrot.slane %v2311_v49, 4  ;;  %v2349_v38 = vor.u32 %v2348_v54, %v2345_v9  ;;  %v2394_v6 = vshll.u32 %v5099_v39, 16  ;;  %v6304_v49 = vld [vmem:[%s6486_s7 + $0xc4] sm:$0xf] }
 0x154   : > { %v2336_v14 = vrot.slane %v2335_v28, 4  ;;  %v2400_v23 = vshll.u32 %v6304_v49, 16  ;;  %v2404_v25 = vshrl.u32 %v6304_v49, 16  ;;  %v2364_v45 = vrot.slane %v2362_v35, 5 }
 0x155   : > { %v2317_v36 = vsel %vm6512_vm4, %v2312_v13, %v2316_v60  ;;  %v2350_v51 = vrot.slane %v2349_v38, 4  ;;  %v2388_v60 = vrot.slane %v2386_v22, 5 }
 0x156   : > { %5857 = vmatmul.mubr.msk.bf16.gmra.mrb[12].mxu0 %vm660_vm3, %v5386_v53  ;;  %v2352_v53 = vshll.u32 %v6301_v27, 16  ;;  %v2341_v59 = vsel %vm6512_vm4, %v2336_v14, %v2340_v30  ;;  %v5114_v44 = vcombine.low %v2307_v0, %v2317_v36  ;;  %v2393_v27 = vrot.slane %v2391_v34, 4 }
 0x157   : > { %5703 = vmatmul.mubr.msk.bf16.gmra.mrb[28].mxu1 %vm660_vm3, %v6249_v19  ;;  %5860 = vmatprep.mubr.msk.bf16.mxu0 %vm660_vm3, %v5387_v33  ;;  %v6302_v33 = vld [vmem:[%s6486_s7 + $0xb8] sm:$0xf]  ;;  %v2369_v19 = vrot.slane %v2367_v20, 4  ;;  %v2402_v21 = vrot.slane %v2400_v23, 5  ;;  %v2406_v47 = vrot.slane %v2404_v25, 4  ;;  %s5416_s7 = sshll.u32 %s6377_s12, 12 }
 0x158   : > { %5724 = vmatprep.mubr.msk.bf16.mxu1 %vm660_vm3, %v5111_v41  ;;  %v2376_v12 = vshll.u32 %v6302_v33, 16  ;;  %v2380_v40 = vshrl.u32 %v6302_v33, 16  ;;  %v2354_v18 = vrot.slane %v2352_v53, 5  ;;  %v2372_v41 = vrot.slane %v2370_v42, 5  ;;  %s8201_s18 = scalar_lea.hbm %s8258_s2, %s5416_s7  ;;  %s8210_s12 = scalar_lea.sflag [#allocation3], %s161_s4 }
 0x159   : > { %v2396_v53 = vrot.slane %v2394_v6, 5 }
 0x15a   : > { %v2378_v52 = vrot.slane %v2376_v12, 5  ;;  %v2382_v2 = vrot.slane %v2380_v40, 4  ;;  %v2355_v20 = vsel %vm6512_vm4, %v2350_v51, %v2354_v18  ;;  %v2407_v12 = vor.u32 %v2406_v47, %v2402_v21 }
 0x15b   : > { %v2397_v33 = vor.u32 %v2396_v53, %v2393_v27 }
 0x15c   : > { %v2383_v7 = vor.u32 %v2382_v2, %v2378_v52  ;;  %v2408_v13 = vrot.slane %v2407_v12, 4 }
 0x15d   : > { %v2398_v40 = vrot.slane %v2397_v33, 4 }
 0x15e   : > { %5861 = vmatmul.mubr.msk.bf16.gmra.mrb[16].mxu0 %vm660_vm3, %v5388_v37  ;;  %v2359_v37 = vor.u32 %v2358_v11, %v2354_v18  ;;  %v2384_v15 = vrot.slane %v2383_v7, 4  ;;  %v2413_v9 = vsel %vm6512_vm4, %v2408_v13, %v2412_v17 }
 0x15f   : > { %5725 = vmatmul.mubr.msk.bf16.vlgmr.msra.gmra.mrb[16].mxu1 %vm660_vm3, %v7880_v1  ;;  %5864 = vmatprep.mubr.msk.bf16.mxu0 %vm660_vm3, %v5389_v3  ;;  %v2373_v1 = vor.u32 %v2372_v41, %v2369_v19  ;;  %v5115_v3 = vcombine.low %v2331_v10, %v2341_v59  ;;  %v2403_v30 = vsel %vm6512_vm4, %v2398_v40, %v2402_v21 }
 0x160   : > { %5728 = vmatprep.mubr.msk.bf16.mxu1 %vm660_vm3, %v5113_v24  ;;  %v2360_v28 = vrot.slane %v2359_v37, 4  ;;  %v2389_v48 = vsel %vm6512_vm4, %v2384_v15, %v2388_v60  ;;  %v5118_v14 = vcombine.low %v2403_v30, %v2413_v9 }
 0x161   : > { %v2374_v46 = vrot.slane %v2373_v1, 4 }
 0x162   : > { %v2365_v42 = vsel %vm6512_vm4, %v2360_v28, %v2364_v45 }
 0x163   : > { %v5116_v62 = vcombine.low %v2355_v20, %v2365_v42 }
 0x166   : > { %5865 = vmatmul.mubr.msk.bf16.gmra.mrb[20].mxu0 %vm660_vm3, %v5390_v8  ;;  %v2379_v8 = vsel %vm6512_vm4, %v2374_v46, %v2378_v52 }
 0x167   : > { %5729 = vmatmul.mubr.msk.bf16.gmra.mrb[20].mxu1 %vm660_vm3, %v5114_v44  ;;  %5868 = vmatprep.mubr.msk.bf16.mxu0 %vm660_vm3, %v5391_v56  ;;  %v5117_v56 = vcombine.low %v2379_v8, %v2389_v48 }
 0x168   : > { %5732 = vmatprep.mubr.msk.bf16.mxu1 %vm660_vm3, %v5115_v3 }
 0x16e   : > { %5869 = vmatmul.mubr.msk.bf16.gmra.mrb[24].mxu0 %vm660_vm3, %v5392_v43 }
 0x16f   : > { %5733 = vmatmul.mubr.msk.bf16.gmra.mrb[24].mxu1 %vm660_vm3, %v5116_v62  ;;  %5872 = vmatprep.mubr.msk.bf16.mxu0 %vm660_vm3, %v5393_v50 }
 0x170   : > { %5736 = vmatprep.mubr.msk.bf16.mxu1 %vm660_vm3, %v5117_v56 }
 0x176   : > { %5873 = vmatmul.mubr.msk.bf16.gmra.mrb[28].mxu0 %vm660_vm3, %v5394_v29 }
 0x177   : > { %5737 = vmatmul.mubr.msk.bf16.gmra.mrb[28].mxu1 %vm660_vm3, %v5118_v14 }
 0x1f2   : > { %v5676_v63 = vpop.f32.mrb[0].mxu1 }
 0x1f3   : > { %v1823_v4 = vpop.f32.mrb[1].mxu1 }
 0x1f4   : > { %v5677_v43 = vpop.f32.mrb[2].mxu1 }
 0x1f5   : > { %v1826_v16 = vpop.f32.mrb[3].mxu1 }
 0x1fa   : > { %v5680_v58 = vpop.f32.mrb[4].mxu1 }
 0x1fb   : > { %v1839_v50 = vpop.f32.mrb[5].mxu1 }
 0x1fc   : > { %v5681_v54 = vpop.f32.mrb[6].mxu1 }
 0x1fd   : > { %v1842_v18 = vpop.f32.mrb[7].mxu1 }
 0x202   : > { %v5684_v32 = vpop.f32.mrb[8].mxu1 }
 0x203   : > { %v1855_v11 = vpop.f32.mrb[9].mxu1 }
 0x204   : > { %v5685_v24 = vpop.f32.mrb[10].mxu1 }
 0x205   : > { %v1858_v19 = vpop.f32.mrb[11].mxu1 }
 0x20a   : > { %v5688_v41 = vpop.f32.mrb[12].mxu1 }
 0x20b   : > { %v1871_v5 = vpop.f32.mrb[13].mxu1 }
 0x20c   : > { %v5689_v55 = vpop.f32.mrb[14].mxu1 }
 0x20d   : > { %v1874_v29 = vpop.f32.mrb[15].mxu1 }
 0x211   : > { %v5846_v52 = vpop.f32.mrb[0].mxu0 }
 0x212   : > { %v5878_v2 = vadd.f32 %v5846_v52, %v5676_v63  ;;  %v4574_v39 = vpop.f32.mrb[1].mxu0 }
 0x213   : > { %v5879_v0 = vadd.f32 %v4574_v39, %v1823_v4  ;;  %v5847_v36 = vpop.f32.mrb[2].mxu0 }
 0x214   : > { %4735 = vst [vmem:[%s8165_s6 + $0x10] sm:$0xff] %v5878_v2  ;;  %v5880_v10 = vadd.f32 %v5847_v36, %v5677_v43  ;;  %v4577_v59 = vpop.f32.mrb[3].mxu0 }
 0x215   : > { %4733 = vst [vmem:[%s8165_s6] sm:$0xff] %v5879_v0  ;;  %v5881_v38 = vadd.f32 %v4577_v59, %v1826_v16 }
 0x216   : > { %4736 = vst [vmem:[%s8165_s6 + $0x18] sm:$0xff] %v5880_v10 }
 0x217   : > { %4734 = vst [vmem:[%s8165_s6 + $0x8] sm:$0xff] %v5881_v38 }
 0x219   : > { %v5850_v37 = vpop.f32.mrb[4].mxu0 }
 0x21a   : > { %v5882_v26 = vadd.f32 %v5850_v37, %v5680_v58  ;;  %v4590_v35 = vpop.f32.mrb[5].mxu0 }
 0x21b   : > { %v5883_v34 = vadd.f32 %v4590_v35, %v1839_v50  ;;  %v5851_v6 = vpop.f32.mrb[6].mxu0 }
 0x21c   : > { %4739 = vst [vmem:[%s8165_s6 + $0x30] sm:$0xff] %v5882_v26  ;;  %v5884_v49 = vadd.f32 %v5851_v6, %v5681_v54  ;;  %v4593_v23 = vpop.f32.mrb[7].mxu0 }
 0x21d   : > { %4737 = vst [vmem:[%s8165_s6 + $0x20] sm:$0xff] %v5883_v34  ;;  %v5885_v25 = vadd.f32 %v4593_v23, %v1842_v18 }
 0x21e   : > { %4740 = vst [vmem:[%s8165_s6 + $0x38] sm:$0xff] %v5884_v49 }
 0x21f   : > { %4738 = vst [vmem:[%s8165_s6 + $0x28] sm:$0xff] %v5885_v25 }
 0x221   : > { %v5854_v1 = vpop.f32.mrb[8].mxu0 }
 0x222   : > { %v5886_v7 = vadd.f32 %v5854_v1, %v5684_v32  ;;  %v4606_v61 = vpop.f32.mrb[9].mxu0 }
 0x223   : > { %v5887_v22 = vadd.f32 %v4606_v61, %v1855_v11  ;;  %v5855_v44 = vpop.f32.mrb[10].mxu0 }
 0x224   : > { %4743 = vst [vmem:[%s8165_s6 + $0x50] sm:$0xff] %v5886_v7  ;;  %v5888_v3 = vadd.f32 %v5855_v44, %v5685_v24  ;;  %v4609_v51 = vpop.f32.mrb[11].mxu0 }
 0x225   : > { %4741 = vst [vmem:[%s8165_s6 + $0x40] sm:$0xff] %v5887_v22  ;;  %v5889_v28 = vadd.f32 %v4609_v51, %v1858_v19 }
 0x226   : > { %4744 = vst [vmem:[%s8165_s6 + $0x58] sm:$0xff] %v5888_v3 }
 0x227   : > { %4742 = vst [vmem:[%s8165_s6 + $0x48] sm:$0xff] %v5889_v28 }
 0x229   : > { %v5858_v45 = vpop.f32.mrb[12].mxu0 }
 0x22a   : > { %v5890_v27 = vadd.f32 %v5858_v45, %v5688_v41  ;;  %v4622_v53 = vpop.f32.mrb[13].mxu0 }
 0x22b   : > { %v5891_v21 = vadd.f32 %v4622_v53, %v1871_v5  ;;  %v5859_v47 = vpop.f32.mrb[14].mxu0 }
 0x22c   : > { %4747 = vst [vmem:[%s8165_s6 + $0x70] sm:$0xff] %v5890_v27  ;;  %v5892_v46 = vadd.f32 %v5859_v47, %v5689_v55  ;;  %v4625_v15 = vpop.f32.mrb[15].mxu0 }
 0x22d   : > { %4745 = vst [vmem:[%s8165_s6 + $0x60] sm:$0xff] %v5891_v21  ;;  %v5893_v60 = vadd.f32 %v4625_v15, %v1874_v29 }
 0x22e   : > { %4748 = vst [vmem:[%s8165_s6 + $0x78] sm:$0xff] %v5892_v46 }
 0x22f   : > { %4746 = vst [vmem:[%s8165_s6 + $0x68] sm:$0xff] %v5893_v60 }
 0x231   : > { %v5862_v20 = vpop.f32.mrb[16].mxu0 }
 0x232   : > { %v5726_v42 = vpop.f32.mrb[16].mxu1  ;;  %v4638_v33 = vpop.f32.mrb[17].mxu0 }
 0x233   : > { %v5894_v12 = vadd.f32 %v5862_v20, %v5726_v42  ;;  %v2613_v31 = vpop.f32.mrb[17].mxu1  ;;  %v5863_v57 = vpop.f32.mrb[18].mxu0 }
 0x234   : > { %v5895_v8 = vadd.f32 %v4638_v33, %v2613_v31  ;;  %v5727_v48 = vpop.f32.mrb[18].mxu1  ;;  %v4641_v62 = vpop.f32.mrb[19].mxu0 }
 0x235   : > { %4751 = vst [vmem:[%s8165_s6 + $0x90] sm:$0xff] %v5894_v12  ;;  %v5896_v56 = vadd.f32 %v5863_v57, %v5727_v48  ;;  %v2616_v40 = vpop.f32.mrb[19].mxu1 }
 0x236   : > { %4749 = vst [vmem:[%s8165_s6 + $0x80] sm:$0xff] %v5895_v8  ;;  %v5897_v13 = vadd.f32 %v4641_v62, %v2616_v40 }
 0x237   : > { %4752 = vst [vmem:[%s8165_s6 + $0x98] sm:$0xff] %v5896_v56 }
 0x238   : > { %4750 = vst [vmem:[%s8165_s6 + $0x88] sm:$0xff] %v5897_v13 }
 0x239   : > { %v5866_v17 = vpop.f32.mrb[20].mxu0 }
 0x23a   : > { %v5730_v30 = vpop.f32.mrb[20].mxu1  ;;  %v4654_v9 = vpop.f32.mrb[21].mxu0 }
 0x23b   : > { %v5898_v14 = vadd.f32 %v5866_v17, %v5730_v30  ;;  %v2629_v63 = vpop.f32.mrb[21].mxu1  ;;  %v5867_v4 = vpop.f32.mrb[22].mxu0 }
 0x23c   : > { %v5899_v43 = vadd.f32 %v4654_v9, %v2629_v63  ;;  %v5731_v16 = vpop.f32.mrb[22].mxu1  ;;  %v4657_v58 = vpop.f32.mrb[23].mxu0 }
 0x23d   : > { %4755 = vst [vmem:[%s8165_s6 + $0xb0] sm:$0xff] %v5898_v14  ;;  %v5900_v50 = vadd.f32 %v5867_v4, %v5731_v16  ;;  %v2632_v54 = vpop.f32.mrb[23].mxu1 }
 0x23e   : > { %4753 = vst [vmem:[%s8165_s6 + $0xa0] sm:$0xff] %v5899_v43  ;;  %v5901_v18 = vadd.f32 %v4657_v58, %v2632_v54 }
 0x23f   : > { %4756 = vst [vmem:[%s8165_s6 + $0xb8] sm:$0xff] %v5900_v50 }
 0x240   : > { %4754 = vst [vmem:[%s8165_s6 + $0xa8] sm:$0xff] %v5901_v18 }
 0x241   : > { %v5870_v32 = vpop.f32.mrb[24].mxu0 }
 0x242   : > { %v5734_v11 = vpop.f32.mrb[24].mxu1  ;;  %v4670_v24 = vpop.f32.mrb[25].mxu0 }
 0x243   : > { %v5902_v19 = vadd.f32 %v5870_v32, %v5734_v11  ;;  %v2645_v41 = vpop.f32.mrb[25].mxu1  ;;  %v5871_v5 = vpop.f32.mrb[26].mxu0 }
 0x244   : > { %v5903_v55 = vadd.f32 %v4670_v24, %v2645_v41  ;;  %v5735_v29 = vpop.f32.mrb[26].mxu1  ;;  %v4673_v52 = vpop.f32.mrb[27].mxu0 }
 0x245   : > { %4759 = vst [vmem:[%s8165_s6 + $0xd0] sm:$0xff] %v5902_v19  ;;  %v5904_v2 = vadd.f32 %v5871_v5, %v5735_v29  ;;  %v2648_v39 = vpop.f32.mrb[27].mxu1 }
 0x246   : > { %4757 = vst [vmem:[%s8165_s6 + $0xc0] sm:$0xff] %v5903_v55  ;;  %v5905_v0 = vadd.f32 %v4673_v52, %v2648_v39 }
 0x247   : > { %4760 = vst [vmem:[%s8165_s6 + $0xd8] sm:$0xff] %v5904_v2 }
 0x248   : > { %4758 = vst [vmem:[%s8165_s6 + $0xc8] sm:$0xff] %v5905_v0 }
 0x249   : > { %v5874_v36 = vpop.f32.mrb[28].mxu0 }
 0x24a   : > { %v5738_v10 = vpop.f32.mrb[28].mxu1  ;;  %v4686_v59 = vpop.f32.mrb[29].mxu0 }
 0x24b   : > { %v5906_v38 = vadd.f32 %v5874_v36, %v5738_v10  ;;  %v2661_v37 = vpop.f32.mrb[29].mxu1  ;;  %v5875_v26 = vpop.f32.mrb[30].mxu0 }
 0x24c   : > { %v5907_v35 = vadd.f32 %v4686_v59, %v2661_v37  ;;  %v5739_v34 = vpop.f32.mrb[30].mxu1  ;;  %v4689_v6 = vpop.f32.mrb[31].mxu0 }
 0x24d   : > { %4763 = vst [vmem:[%s8165_s6 + $0xf0] sm:$0xff] %v5906_v38  ;;  %v5908_v49 = vadd.f32 %v5875_v26, %v5739_v34  ;;  %v2664_v23 = vpop.f32.mrb[31].mxu1 }
 0x24e   : > { %4761 = vst [vmem:[%s8165_s6 + $0xe0] sm:$0xff] %v5907_v35  ;;  %v5909_v25 = vadd.f32 %v4689_v6, %v2664_v23 }
 0x24f   : > { %4764 = vst [vmem:[%s8165_s6 + $0xf8] sm:$0xff] %v5908_v49 }
 0x250   : > { %4762 = vst [vmem:[%s8165_s6 + $0xe8] sm:$0xff] %v5909_v25 }
 0x251   : > { %6320 = shalt.err (!%p6317_p5)
}
 0x252   : > { %s6321_s26 = scalar_lea.hbm %s8201_s18, 4096  ;;  %s6325_s29 = scalar_lea.hbm %s8258_s2, 8192 }
 0x253   : > { %p6322_p6 = scmp.ne.s32.totalorder %s8201_s18, %s6321_s26  ;;  %p6326_p10 = scmp.lt.u32.totalorder %s8201_s18, %s8258_s2 }
 0x254   : > { %p6327_p11 = scmp.lt.u32.totalorder %s6325_s29, %s6321_s26  ;;  %p6329_p13 = scmp.lt.u32.totalorder %s6321_s26, %s8201_s18 }
 0x255   : > { %p6323_p7 = pnand %p6322_p6, %p6445_p4 }
 0x256   : > { %p6328_p12 = por %p6327_p11, %p6326_p10 }
 0x257   : > { %p6324_p9 = pneg %p6323_p7 }
 0x258   : > { %p6330_p0 = por %p6329_p13, %p6328_p12 }
 0x25a   : > { %p6331_p1 = pnand %p6330_p0, %p6324_p9 }
 0x25c   : > { %6334 = shalt.err (!%p6331_p1)
}
 0x25d   : > { %s6388_s4 = smov 128   ;;  %s6389_s5 = smov 8  }
 0x25e   : > { %6145 = dma.vmem_to_hbm [thread:$0]  (%p6445_p4), %s8203_s8, 4096, %s8201_s18, %s8210_s12, %s6388_s4, %s6388_s4, %s6389_s5  }
 0x25f PF: > { %p6151_p2 = scmp.ge.s32.totalorder %s6385_s14, 2  ;;  %s4795_s6 = sand.u32 1, %s6365_s9  }
 0x260   : > { %s4796_s7 = scalar_lea.sflag [#allocation3], %s4795_s6 }
 0x261   : > { %p6148_p3 = pnand %p6151_p2, %p6452_p8 }
 0x263   : > { %6360 = dma.done.wait (!%p6148_p3), %s4796_s7, 4096  }
 0x264   : > { %6362 = vsyncadd (!%p6148_p3), %s4796_s7, 4294963200  ;;  %s15_s14 = sadd.s32 1, %s6385_s14   ;;  %s8328_s9 = smov %s6369_s10 }
 0x265   : > { %p12_p5 = scmp.ge.s32.totalorder %s15_s14, 4   ;;  %s8329_s10 = smov %s6373_s11 }
 0x266   : > { %s8330_s11 = smov %s6458_s22  ;;  %s8331_s12 = smov %s6381_s13 }
 0x267   : > { %s8332_s13 = smov %s8334_s17  ;;  %14 = sbr.rel (!%p12_p5) target bundleno = 4 (0x4), region = 76 }
 0x26e   :  { %4801 = vsyncpa [#allocation3], 1 }
 0x26f   :  { %4803 = vsyncpa [#allocation3 + $0x1], 1 }

</bundles_post_ra>
